<compile_context>
chip_gen: v6e
topology: v6e:2x2x1
jax: 0.10.0
libtpu: 0.0.40
codegen_flags: <defaults>
</compile_context>

<pallas_src>
import functools

import jax
import jax.numpy as jnp
from jax.experimental import pallas as pl
from jax.experimental.pallas import tpu as pltpu


# ---------------------------------------------------------------------------
# Fused kernel: depthwise conv + pointwise matmul + (folded BN shift) + ReLU
# ---------------------------------------------------------------------------
def _dsconv_kernel(x_ref, wd_ref, wp_ref, t_ref, o_ref, *, kh, kw):
    # x_ref : (1, Hp, Wp, Cin)    padded NHWC input block (bf16)
    # wd_ref: (kh*kw, Cin)        depthwise taps (f32)
    # wp_ref: (Cin, Cpad)         pointwise weight, BN scale folded in, zero-padded (bf16)
    # t_ref : (1, Cpad)           folded shift (dw bias + pw bias + BN), zero-padded (f32)
    # o_ref : (1, Ho*Wo, Cpad)    flat lane-dense output block (f32)
    Hp, Wp, Cin = x_ref.shape[1], x_ref.shape[2], x_ref.shape[3]
    M, Cpad = o_ref.shape[1], o_ref.shape[2]
    Ho, Wo = Hp - kh + 1, Wp - kw + 1

    xp = x_ref[0]  # (Hp, Wp, Cin), bf16

    # Hoist the sublane-unaligned W-axis shifts out of the tap loop: kw shifted
    # copies instead of kh*kw.  Inside the loop we only slice along H (leading,
    # untiled dim), which is free of relayout cost.
    xs = [xp[:, dj:dj + Wo, :] for dj in range(kw)]

    # Depthwise conv: per-channel MAC over the kh*kw taps (channels on lanes),
    # bf16 inputs, f32 accumulation.
    dw = jnp.zeros((Ho, Wo, Cin), jnp.float32)
    for di in range(kh):
        for dj in range(kw):
            w_t = wd_ref[di * kw + dj, :].reshape(1, 1, Cin)        # f32
            dw = dw + xs[dj][di:di + Ho] * w_t                      # promotes to f32

    # Pointwise 1x1 conv on the MXU (bf16 in, f32 acc), BN scale already folded
    # into wp columns.  Epilogue is just add + ReLU.
    a = dw.reshape(M, Cin).astype(jnp.bfloat16)
    y = jnp.dot(a, wp_ref[...], preferred_element_type=jnp.float32)  # (M, Cpad)
    o_ref[0] = jnp.maximum(y + t_ref[...], 0.0).astype(o_ref.dtype)


# ---------------------------------------------------------------------------
# Module wrapper (PyTorch NCHW at the boundary)
# ---------------------------------------------------------------------------
def depth_separable_conv(x, w_dw, b_dw, w_pw, b_pw, bn, *, padding):
    """x:(B,Cin,H,W) NCHW; w_dw:(Cin,1,kh,kw); w_pw:(Cout,Cin,1,1). Returns NCHW."""
    B, Cin, H, W = x.shape
    Cout = w_pw.shape[0]
    kh, kw = w_dw.shape[2], w_dw.shape[3]

    # NHWC inside; spatial padding + bf16 cast in the wrapper (cheap, tiny tensors).
    xh = jnp.transpose(x, (0, 2, 3, 1))
    if padding:
        xh = jnp.pad(xh, ((0, 0), (padding, padding), (padding, padding), (0, 0)))
    xh = xh.astype(jnp.bfloat16)
    Hp, Wp = xh.shape[1], xh.shape[2]
    Ho, Wo = Hp - kh + 1, Wp - kw + 1
    M = Ho * Wo

    # One-time weight prep (outside the hot path).
    wd = jnp.transpose(w_dw[:, 0, :, :], (1, 2, 0)).reshape(kh * kw, Cin)  # (kh*kw, Cin) f32
    wp_f32 = jnp.transpose(w_pw[:, :, 0, 0], (1, 0))                       # (Cin, Cout) f32

    # Fold eval-mode BatchNorm + pointwise bias + depthwise bias into the
    # pointwise weight (scale) and a single per-channel shift.  Scaling is done
    # in f32 *before* the bf16 cast to avoid compounding quantization error.
    gamma, beta, mean, var, eps = bn
    scale = gamma / jnp.sqrt(var + eps)                      # (Cout,)
    wp_scaled = wp_f32 * scale[None, :]                      # (Cin, Cout) f32
    shift = beta + scale * (b_pw - mean) + b_dw @ wp_scaled  # (Cout,)

    # Lane-dense output: pad Cout to a multiple of 128 with zero columns.
    Cpad = -(-Cout // 128) * 128
    wp_pad = jnp.zeros((Cin, Cpad), jnp.float32).at[:, :Cout].set(wp_scaled)
    wp_pad = wp_pad.astype(jnp.bfloat16)
    shift_pad = jnp.zeros((1, Cpad), jnp.float32).at[0, :Cout].set(shift)

    out_flat = pl.pallas_call(
        functools.partial(_dsconv_kernel, kh=kh, kw=kw),
        out_shape=jax.ShapeDtypeStruct((B, M, Cpad), jnp.float32),
        grid_spec=pltpu.PrefetchScalarGridSpec(
            num_scalar_prefetch=0,
            grid=(B,),  # feeds both TCs on v7x at B>=2; ~0.35 us/step elsewhere
            in_specs=[
                pl.BlockSpec((1, Hp, Wp, Cin), lambda b: (b, 0, 0, 0)),  # input image
                pl.BlockSpec((kh * kw, Cin), lambda b: (0, 0)),          # dw taps
                pl.BlockSpec((Cin, Cpad), lambda b: (0, 0)),             # pw weight (scaled)
                pl.BlockSpec((1, Cpad), lambda b: (0, 0)),               # folded shift
            ],
            out_specs=pl.BlockSpec((1, M, Cpad), lambda b: (b, 0, 0)),
        ),
        compiler_params=pltpu.CompilerParams(dimension_semantics=("parallel",)),
    )(xh, wd, wp_pad, shift_pad)

    # Slice off the zero-padded channels and restore NCHW (one-time layout work).
    out = out_flat[:, :, :Cout].reshape(B, Ho, Wo, Cout)
    return jnp.transpose(out, (0, 3, 1, 2))


# ---------------------------------------------------------------------------
# Pure-JAX reference (for correctness check)
# ---------------------------------------------------------------------------
def reference(x, w_dw, b_dw, w_pw, b_pw, bn, *, padding):
    Cin = x.shape[1]
    dn = jax.lax.conv_dimension_numbers(x.shape, w_dw.shape, ("NCHW", "OIHW", "NCHW"))
    y = jax.lax.conv_general_dilated(
        x, w_dw, (1, 1), [(padding, padding), (padding, padding)],
        dimension_numbers=dn, feature_group_count=Cin)
    y = y + b_dw.reshape(1, -1, 1, 1)
    dn2 = jax.lax.conv_dimension_numbers(y.shape, w_pw.shape, ("NCHW", "OIHW", "NCHW"))
    y = jax.lax.conv_general_dilated(y, w_pw, (1, 1), [(0, 0), (0, 0)],
                                     dimension_numbers=dn2)
    y = y + b_pw.reshape(1, -1, 1, 1)
    gamma, beta, mean, var, eps = bn
    y = (y - mean.reshape(1, -1, 1, 1)) * (gamma.reshape(1, -1, 1, 1)
        / jnp.sqrt(var.reshape(1, -1, 1, 1) + eps)) + beta.reshape(1, -1, 1, 1)
    return jnp.maximum(y, 0.0)


if __name__ == "__main__":
    key = jax.random.PRNGKey(0)
    kx, k1, k2, k3, k4 = jax.random.split(key, 5)

    # Small shapes consistent with the module: Conv2d(ch_in, ch_in, k, groups=ch_in)
    # then Conv2d(ch_in, ch_out, 1), BN, ReLU.
    B, Cin, Cout, H, W = 2, 32, 64, 16, 16
    ksize, pad = 3, 1

    x = jax.random.normal(kx, (B, Cin, H, W), jnp.float32)
    w_dw = 0.05 * jax.random.normal(k1, (Cin, 1, ksize, ksize), jnp.float32)
    b_dw = 0.05 * jax.random.normal(k2, (Cin,), jnp.float32)
    w_pw = 0.05 * jax.random.normal(k3, (Cout, Cin, 1, 1), jnp.float32)
    b_pw = 0.05 * jax.random.normal(k4, (Cout,), jnp.float32)
    # Fresh PyTorch BatchNorm2d stats (eval mode): gamma=1, beta=0, mean=0, var=1.
    bn = (jnp.ones((Cout,), jnp.float32), jnp.zeros((Cout,), jnp.float32),
          jnp.zeros((Cout,), jnp.float32), jnp.ones((Cout,), jnp.float32), 1e-5)

    fwd = jax.jit(functools.partial(depth_separable_conv, padding=pad))
    out = jax.block_until_ready(fwd(x, w_dw, b_dw, w_pw, b_pw, bn))

    assert out.shape == (B, Cout, H, W), out.shape
    assert jnp.all(jnp.isfinite(out))

    ref = reference(x, w_dw, b_dw, w_pw, b_pw, bn, padding=pad)
    err = float(jnp.max(jnp.abs(out - ref)))
    # bf16 input / bf16 MXU operands with f32 accumulation -> ~1e-3 abs error.
    assert jnp.allclose(out, ref, rtol=2e-2, atol=5e-3), f"max abs err {err}"

    print("KERNEL_OK")
</pallas_src>

<mosaic_0001>
module attributes {stable_mosaic.version = 11 : i64} {
  func.func @_dsconv_kernel(%arg0: i32, %arg1: memref<1x18x18x32xbf16, #tpu.memory_space<vmem>>, %arg2: memref<9x32xf32, #tpu.memory_space<vmem>>, %arg3: memref<32x128xbf16, #tpu.memory_space<vmem>>, %arg4: memref<1x128xf32, #tpu.memory_space<vmem>>, %arg5: memref<1x256x128xf32, #tpu.memory_space<vmem>>) attributes {dimension_semantics = [#tpu.dimension_semantics<parallel>], iteration_bounds = array<i64: 2>, scalar_prefetch = 0 : i64, scratch_operands = 0 : i64, tpu.core_type = #tpu.core_type<tc>, window_params = [{transform_indices = @transform_0, window_bounds = array<i64: 1, 18, 18, 32>}, {pipeline_mode = #tpu.pipeline_mode<synchronous>, transform_indices = @transform_1, window_bounds = array<i64: 9, 32>}, {pipeline_mode = #tpu.pipeline_mode<synchronous>, transform_indices = @transform_2, window_bounds = array<i64: 32, 128>}, {pipeline_mode = #tpu.pipeline_mode<synchronous>, transform_indices = @transform_3, window_bounds = array<i64: 1, 128>}, {transform_indices = @transform_4, window_bounds = array<i64: 1, 256, 128>}]} {
    %c0 = arith.constant 0 : index
    %c0_0 = arith.constant 0 : index
    %c0_1 = arith.constant 0 : index
    %c0_2 = arith.constant 0 : index
    %0 = vector.load %arg1[%c0, %c0_0, %c0_1, %c0_2] : memref<1x18x18x32xbf16, #tpu.memory_space<vmem>>, vector<1x18x18x32xbf16>
    %1 = vector.shape_cast %0 : vector<1x18x18x32xbf16> to vector<18x18x32xbf16>
    %2 = vector.extract_strided_slice %1 {offsets = [0, 0, 0], sizes = [18, 16, 32], strides = [1, 1, 1]} : vector<18x18x32xbf16> to vector<18x16x32xbf16>
    %3 = vector.extract_strided_slice %1 {offsets = [0, 1, 0], sizes = [18, 16, 32], strides = [1, 1, 1]} : vector<18x18x32xbf16> to vector<18x16x32xbf16>
    %4 = vector.extract_strided_slice %1 {offsets = [0, 2, 0], sizes = [18, 16, 32], strides = [1, 1, 1]} : vector<18x18x32xbf16> to vector<18x16x32xbf16>
    %cst = arith.constant 0.000000e+00 : f32
    %5 = vector.broadcast %cst : f32 to vector<16x16x32xf32>
    %c0_3 = arith.constant 0 : index
    %c0_4 = arith.constant 0 : index
    %6 = vector.load %arg2[%c0_3, %c0_4] : memref<9x32xf32, #tpu.memory_space<vmem>>, vector<1x32xf32>
    %7 = vector.shape_cast %6 : vector<1x32xf32> to vector<32xf32>
    %8 = vector.shape_cast %7 : vector<32xf32> to vector<1x1x32xf32>
    %9 = vector.extract_strided_slice %2 {offsets = [0, 0, 0], sizes = [16, 16, 32], strides = [1, 1, 1]} : vector<18x16x32xbf16> to vector<16x16x32xbf16>
    %10 = arith.extf %9 : vector<16x16x32xbf16> to vector<16x16x32xf32>
    %11 = vector.broadcast %8 : vector<1x1x32xf32> to vector<16x16x32xf32>
    %12 = arith.mulf %10, %11 : vector<16x16x32xf32>
    %13 = arith.addf %5, %12 : vector<16x16x32xf32>
    %c1 = arith.constant 1 : index
    %c0_5 = arith.constant 0 : index
    %14 = vector.load %arg2[%c1, %c0_5] : memref<9x32xf32, #tpu.memory_space<vmem>>, vector<1x32xf32>
    %15 = vector.shape_cast %14 : vector<1x32xf32> to vector<32xf32>
    %16 = vector.shape_cast %15 : vector<32xf32> to vector<1x1x32xf32>
    %17 = vector.extract_strided_slice %3 {offsets = [0, 0, 0], sizes = [16, 16, 32], strides = [1, 1, 1]} : vector<18x16x32xbf16> to vector<16x16x32xbf16>
    %18 = arith.extf %17 : vector<16x16x32xbf16> to vector<16x16x32xf32>
    %19 = vector.broadcast %16 : vector<1x1x32xf32> to vector<16x16x32xf32>
    %20 = arith.mulf %18, %19 : vector<16x16x32xf32>
    %21 = arith.addf %13, %20 : vector<16x16x32xf32>
    %c2 = arith.constant 2 : index
    %c0_6 = arith.constant 0 : index
    %22 = vector.load %arg2[%c2, %c0_6] : memref<9x32xf32, #tpu.memory_space<vmem>>, vector<1x32xf32>
    %23 = vector.shape_cast %22 : vector<1x32xf32> to vector<32xf32>
    %24 = vector.shape_cast %23 : vector<32xf32> to vector<1x1x32xf32>
    %25 = vector.extract_strided_slice %4 {offsets = [0, 0, 0], sizes = [16, 16, 32], strides = [1, 1, 1]} : vector<18x16x32xbf16> to vector<16x16x32xbf16>
    %26 = arith.extf %25 : vector<16x16x32xbf16> to vector<16x16x32xf32>
    %27 = vector.broadcast %24 : vector<1x1x32xf32> to vector<16x16x32xf32>
    %28 = arith.mulf %26, %27 : vector<16x16x32xf32>
    %29 = arith.addf %21, %28 : vector<16x16x32xf32>
    %c3 = arith.constant 3 : index
    %c0_7 = arith.constant 0 : index
    %30 = vector.load %arg2[%c3, %c0_7] : memref<9x32xf32, #tpu.memory_space<vmem>>, vector<1x32xf32>
    %31 = vector.shape_cast %30 : vector<1x32xf32> to vector<32xf32>
    %32 = vector.shape_cast %31 : vector<32xf32> to vector<1x1x32xf32>
    %33 = vector.extract_strided_slice %2 {offsets = [1, 0, 0], sizes = [16, 16, 32], strides = [1, 1, 1]} : vector<18x16x32xbf16> to vector<16x16x32xbf16>
    %34 = arith.extf %33 : vector<16x16x32xbf16> to vector<16x16x32xf32>
    %35 = vector.broadcast %32 : vector<1x1x32xf32> to vector<16x16x32xf32>
    %36 = arith.mulf %34, %35 : vector<16x16x32xf32>
    %37 = arith.addf %29, %36 : vector<16x16x32xf32>
    %c4 = arith.constant 4 : index
    %c0_8 = arith.constant 0 : index
    %38 = vector.load %arg2[%c4, %c0_8] : memref<9x32xf32, #tpu.memory_space<vmem>>, vector<1x32xf32>
    %39 = vector.shape_cast %38 : vector<1x32xf32> to vector<32xf32>
    %40 = vector.shape_cast %39 : vector<32xf32> to vector<1x1x32xf32>
    %41 = vector.extract_strided_slice %3 {offsets = [1, 0, 0], sizes = [16, 16, 32], strides = [1, 1, 1]} : vector<18x16x32xbf16> to vector<16x16x32xbf16>
    %42 = arith.extf %41 : vector<16x16x32xbf16> to vector<16x16x32xf32>
    %43 = vector.broadcast %40 : vector<1x1x32xf32> to vector<16x16x32xf32>
    %44 = arith.mulf %42, %43 : vector<16x16x32xf32>
    %45 = arith.addf %37, %44 : vector<16x16x32xf32>
    %c5 = arith.constant 5 : index
    %c0_9 = arith.constant 0 : index
    %46 = vector.load %arg2[%c5, %c0_9] : memref<9x32xf32, #tpu.memory_space<vmem>>, vector<1x32xf32>
    %47 = vector.shape_cast %46 : vector<1x32xf32> to vector<32xf32>
    %48 = vector.shape_cast %47 : vector<32xf32> to vector<1x1x32xf32>
    %49 = vector.extract_strided_slice %4 {offsets = [1, 0, 0], sizes = [16, 16, 32], strides = [1, 1, 1]} : vector<18x16x32xbf16> to vector<16x16x32xbf16>
    %50 = arith.extf %49 : vector<16x16x32xbf16> to vector<16x16x32xf32>
    %51 = vector.broadcast %48 : vector<1x1x32xf32> to vector<16x16x32xf32>
    %52 = arith.mulf %50, %51 : vector<16x16x32xf32>
    %53 = arith.addf %45, %52 : vector<16x16x32xf32>
    %c6 = arith.constant 6 : index
    %c0_10 = arith.constant 0 : index
    %54 = vector.load %arg2[%c6, %c0_10] : memref<9x32xf32, #tpu.memory_space<vmem>>, vector<1x32xf32>
    %55 = vector.shape_cast %54 : vector<1x32xf32> to vector<32xf32>
    %56 = vector.shape_cast %55 : vector<32xf32> to vector<1x1x32xf32>
    %57 = vector.extract_strided_slice %2 {offsets = [2, 0, 0], sizes = [16, 16, 32], strides = [1, 1, 1]} : vector<18x16x32xbf16> to vector<16x16x32xbf16>
    %58 = arith.extf %57 : vector<16x16x32xbf16> to vector<16x16x32xf32>
    %59 = vector.broadcast %56 : vector<1x1x32xf32> to vector<16x16x32xf32>
    %60 = arith.mulf %58, %59 : vector<16x16x32xf32>
    %61 = arith.addf %53, %60 : vector<16x16x32xf32>
    %c7 = arith.constant 7 : index
    %c0_11 = arith.constant 0 : index
    %62 = vector.load %arg2[%c7, %c0_11] : memref<9x32xf32, #tpu.memory_space<vmem>>, vector<1x32xf32>
    %63 = vector.shape_cast %62 : vector<1x32xf32> to vector<32xf32>
    %64 = vector.shape_cast %63 : vector<32xf32> to vector<1x1x32xf32>
    %65 = vector.extract_strided_slice %3 {offsets = [2, 0, 0], sizes = [16, 16, 32], strides = [1, 1, 1]} : vector<18x16x32xbf16> to vector<16x16x32xbf16>
    %66 = arith.extf %65 : vector<16x16x32xbf16> to vector<16x16x32xf32>
    %67 = vector.broadcast %64 : vector<1x1x32xf32> to vector<16x16x32xf32>
    %68 = arith.mulf %66, %67 : vector<16x16x32xf32>
    %69 = arith.addf %61, %68 : vector<16x16x32xf32>
    %c8 = arith.constant 8 : index
    %c0_12 = arith.constant 0 : index
    %70 = vector.load %arg2[%c8, %c0_12] : memref<9x32xf32, #tpu.memory_space<vmem>>, vector<1x32xf32>
    %71 = vector.shape_cast %70 : vector<1x32xf32> to vector<32xf32>
    %72 = vector.shape_cast %71 : vector<32xf32> to vector<1x1x32xf32>
    %73 = vector.extract_strided_slice %4 {offsets = [2, 0, 0], sizes = [16, 16, 32], strides = [1, 1, 1]} : vector<18x16x32xbf16> to vector<16x16x32xbf16>
    %74 = arith.extf %73 : vector<16x16x32xbf16> to vector<16x16x32xf32>
    %75 = vector.broadcast %72 : vector<1x1x32xf32> to vector<16x16x32xf32>
    %76 = arith.mulf %74, %75 : vector<16x16x32xf32>
    %77 = arith.addf %69, %76 : vector<16x16x32xf32>
    %78 = vector.shape_cast %77 : vector<16x16x32xf32> to vector<256x32xf32>
    %79 = arith.truncf %78 : vector<256x32xf32> to vector<256x32xbf16>
    %c0_13 = arith.constant 0 : index
    %c0_14 = arith.constant 0 : index
    %80 = vector.load %arg3[%c0_13, %c0_14] : memref<32x128xbf16, #tpu.memory_space<vmem>>, vector<32x128xbf16>
    %cst_15 = arith.constant dense<0.000000e+00> : vector<256x128xf32>
    %81 = tpu.matmul %79, %80, %cst_15 {dimension_numbers = #tpu.dot_dimension_numbers<[1], [0], [0], [1], [0, 0, 1, 1], [], []>} : vector<256x32xbf16>, vector<32x128xbf16>, vector<256x128xf32> -> vector<256x128xf32>
    %c0_16 = arith.constant 0 : index
    %c0_17 = arith.constant 0 : index
    %82 = vector.load %arg4[%c0_16, %c0_17] : memref<1x128xf32, #tpu.memory_space<vmem>>, vector<1x128xf32>
    %83 = vector.broadcast %82 : vector<1x128xf32> to vector<256x128xf32>
    %84 = arith.addf %81, %83 : vector<256x128xf32>
    %cst_18 = arith.constant 0.000000e+00 : f32
    %85 = vector.broadcast %cst_18 : f32 to vector<256x128xf32>
    %86 = arith.maximumf %84, %85 : vector<256x128xf32>
    %c0_19 = arith.constant 0 : index
    %c0_20 = arith.constant 0 : index
    %c0_21 = arith.constant 0 : index
    %87 = vector.load %arg5[%c0_19, %c0_20, %c0_21] : memref<1x256x128xf32, #tpu.memory_space<vmem>>, vector<1x256x128xf32>
    %88 = vector.shape_cast %87 : vector<1x256x128xf32> to vector<256x128xf32>
    %89 = vector.shape_cast %86 : vector<256x128xf32> to vector<1x256x128xf32>
    tpu.vector_store %arg5[%c0_19, %c0_20, %c0_21], %89 {strides = array<i32>} : memref<1x256x128xf32, #tpu.memory_space<vmem>>, vector<1x256x128xf32>,
    return
  }
  func.func @transform_0(%arg0: i32) -> (i32, i32, i32, i32) {
    %c0_i32 = arith.constant 0 : i32
    %c0_i32_0 = arith.constant 0 : i32
    %c0_i32_1 = arith.constant 0 : i32
    %c0_i32_2 = arith.constant 0 : i32
    return %arg0, %c0_i32, %c0_i32_0, %c0_i32_1 : i32, i32, i32, i32
  }
  func.func @transform_1(%arg0: i32) -> (i32, i32) {
    %c0_i32 = arith.constant 0 : i32
    %c0_i32_0 = arith.constant 0 : i32
    %c0_i32_1 = arith.constant 0 : i32
    return %c0_i32, %c0_i32_0 : i32, i32
  }
  func.func @transform_2(%arg0: i32) -> (i32, i32) {
    %c0_i32 = arith.constant 0 : i32
    %c0_i32_0 = arith.constant 0 : i32
    %c0_i32_1 = arith.constant 0 : i32
    return %c0_i32, %c0_i32_0 : i32, i32
  }
  func.func @transform_3(%arg0: i32) -> (i32, i32) {
    %c0_i32 = arith.constant 0 : i32
    %c0_i32_0 = arith.constant 0 : i32
    %c0_i32_1 = arith.constant 0 : i32
    return %c0_i32, %c0_i32_0 : i32, i32
  }
  func.func @transform_4(%arg0: i32) -> (i32, i32, i32) {
    %c0_i32 = arith.constant 0 : i32
    %c0_i32_0 = arith.constant 0 : i32
    %c0_i32_1 = arith.constant 0 : i32
    return %arg0, %c0_i32, %c0_i32_0 : i32, i32, i32
  }
}

</mosaic_0001>

<bundles_post_ra>
// kernel: depth_separable_conv.1
= control target key start
LH: loop header
LB: loop body
LE: loop exit
PB: predicated region body
PF: predicated region fallthrough
CT: control target
= control target key end

     0   :  { %9 = vsyncpa [#allocation3], 0  ;;  %s4080_s0 = inlined_call_operand.vmem [shape: bf16[2,18,18,32], index: 0, kind: input, shape index: {}]   ;;  %s4081_s1 = inlined_call_operand.vmem [shape: f32[9,32], index: 1, kind: input, shape index: {}]   ;;  %s4082_s2 = inlined_call_operand.vmem [shape: bf16[32,128], index: 2, kind: input, shape index: {}]   ;;  %s4083_s3 = inlined_call_operand.vmem [shape: f32[1,128], index: 3, kind: input, shape index: {}]   ;;  %s4084_s4 = inlined_call_operand.hbm [shape: f32[2,256,128], index: 4, kind: output, shape index: {}]  }
   0x1   :  { %11 = vsyncpa [#allocation3 + $0x1], 0  ;;  %s2667_s15 = smov 0   ;;  %s2669_s16 = smov 0  }
   0x2   :  { %s2671_s17 = smov 0   ;;  %s2673_s18 = smov 0  }
   0x3 LB: > { %s2688_s19 = sadd.s32 4294967295, %s2637_s18   ;;  %s2373_s20 = sadd.s32 4294967294, %s2637_s18   ;;  %s2637_s18 = sphi %s2673_s18, %s4090_s18   ;;  %s2633_s17 = sphi %s2671_s17, %s4089_s17   ;;  %s2629_s16 = sphi %s2669_s16, %s4088_s16   ;;  %s2625_s15 = sphi %s2667_s15, %s4087_s15  }
   0x4   : > { %s2692_s21 = sadd.s32 1, %s2637_s18   ;;  %s113_s22 = sadd.s32 1, %s2633_s17 }
   0x5   : > { %s110_s23 = ssub.s32 %s2637_s18, %s2692_s21  ;;  %p123_p0 = scmp.ne.s32.totalorder %s2633_s17, %s2629_s16 }
   0x6   : > { %p111_p1 = scmp.eq.s32.totalorder %s110_s23, 0  ;;  %p124_p2 = scmp.eq.s32.totalorder %s2688_s19, 1 }
   0x7   : > { %p129_p3 = scmp.ne.s32.totalorder %s2629_s16, %s2625_s15  ;;  %p130_p4 = scmp.eq.s32.totalorder %s2373_s20, 1 }
   0x8   : > { %s2703_s24 = scalar_select %p111_p1, %s2633_s17, %s113_s22  }
   0x9   : > { %p2705_p5 = por %p124_p2, %p123_p0  ;;  %p2709_p6 = por %p130_p4, %p129_p3 }
   0xa   : > { %p2376_p7 = scmp.ge.s32.totalorder %s2637_s18, 1  ;;  %p165_p8 = scmp.lt.s32.totalorder %s2637_s18, 3 }
   0xc   : > { %p166_p9 = pnand %p2376_p7, %p165_p8 }
   0xd   : > { %p191_p10 = scmp.lt.s32.totalorder (!%p166_p9), %s2688_s19, 1  ;;  %s2412_s29 = sshll.u32 (!%p166_p9), %s2688_s19, 12 }
   0xe   : > { %169 = sbr.rel (%p166_p9) target bundleno = 544 (0x220), region = 36  ;;  %s4032_s7 = scalar_lea.hbm (!%p166_p9), %s4084_s4, %s2412_s29 }
   0xf   : > { %s2639_s10 = smov (!%p166_p9), [#allocation2]  }
  0x10   : > { %s2581_s11 = sshll.u32 (!%p166_p9), %s2639_s10, 4  ;;  %s2582_s11 = int_to_ptr.vmem [resolvable:$false] %s2581_s11 }
  0x11   : > { %s2583_s12 = scalar_lea.vmem (!%p166_p9), %s2582_s11, 8192 }
  0x13   : > { %v2557_v0 = vld [vmem:[%s4082_s2 + $0x8] sm:$0xff]   ;;  %v2558_v1 = vld [vmem:[%s4082_s2] sm:$0xff]   ;;  %s192_s5 = scalar_select %p191_p10, %s2688_s19, 1  ;;  %vm469_vm0 = vcmask 1046528   ;;  %vm715_vm1 = vcmask 1045504   ;;  %vm2023_vm2 = vcmask 261120  }
  0x14   : > { %2475 = vmatprep.subr.bf16.mxu0 %v2557_v0  ;;  %2511 = vmatprep.subr.bf16.mxu1 %v2557_v0  ;;  %v2731_v2 = vld [vmem:[%s4081_s1] ss:$0 sm:$0xff]  ;;  %v2736_v3 = vld [vmem:[%s4081_s1 + $0x1] ss:$0 sm:$0xff]  ;;  %v2741_v4 = vld [vmem:[%s4081_s1 + $0x2] ss:$0 sm:$0xff] }
  0x15   : > { %2476 = vmatpush3.bf16.msra.mxu0 %v2557_v0  ;;  %2513 = vmatpush3.bf16.msra.mxu1 %v2557_v0  ;;  %s2515_s6 = smul.u32 216, %s192_s5  ;;  %v2762_v19 = vld [vmem:[%s4081_s1 + $0x3] ss:$0 sm:$0xff]  ;;  %v2776_v28 = vld [vmem:[%s4081_s1 + $0x4] ss:$0 sm:$0xff] }
  0x16   : > { %2477 = vmatprep.subr.bf16.mxu0 %v2558_v1  ;;  %2512 = vmatprep.subr.bf16.mxu1 %v2558_v1  ;;  %v2786_v33 = vld [vmem:[%s4081_s1 + $0x5] ss:$0 sm:$0xff]  ;;  %v2802_v46 = vld [vmem:[%s4081_s1 + $0x6] ss:$0 sm:$0xff]  ;;  %v2812_v55 = vld [vmem:[%s4081_s1 + $0x7] ss:$0 sm:$0xff] }
  0x17   : > { %s2726_s9 = scalar_lea.vmem %s4080_s0, %s2515_s6  ;;  %v2821_v0 = vld [vmem:[%s4081_s1 + $0x8] ss:$0 sm:$0xff] }
  0x18   : > { %v2414_v5 = vld [vmem:[%s2726_s9] sm:$0xff]   ;;  %v199_v6 = vld [vmem:[%s2726_s9 + $0x8] sm:$0x1]  ;;  %v200_v7 = vld [vmem:[%s2726_s9 + $0xc] sm:$0xff]  }
  0x19   : > { %2478 = vmatpush3.bf16.msra.mxu0 %v2558_v1  ;;  %2514 = vmatpush3.bf16.msra.mxu1 %v2558_v1  ;;  %v2415_v8 = vunpack.c.l.bf16 %v2414_v5  ;;  %v2416_v9 = vunpack.c.h.bf16 %v2414_v5  ;;  %v202_v10 = vld [vmem:[%s2726_s9 + $0x14] sm:$0x1]  ;;  %v2449_v11 = vld [vmem:[%s2726_s9 + $0x18] sm:$0xff]   ;;  %v205_v12 = vld [vmem:[%s2726_s9 + $0x20] sm:$0x1]  ;;  %v2749_v13 = vunpack.c.l.bf16 %v200_v7  ;;  %v2751_v14 = vunpack.c.h.bf16 %v200_v7 }
  0x1a   : > { %v2753_v15 = vunpack.c.l.bf16 %v2449_v11  ;;  %v2755_v16 = vunpack.c.h.bf16 %v2449_v11  ;;  %v353_v17 = vunpack.c.l.bf16 %v199_v6  ;;  %v2757_v18 = vunpack.c.l.bf16 %v202_v10 }
  0x1b   : > { %v288_v20 = vmul.f32 %v2415_v8, %v2731_v2  ;;  %v289_v21 = vmul.f32 %v2416_v9, %v2731_v2  ;;  %v2766_v22 = vunpack.c.l.bf16 %v205_v12  ;;  %v373_v23 = vmul.f32 %v2415_v8, %v2736_v3  ;;  %v2452_v12 = vld [vmem:[%s2726_s9 + $0x60] sm:$0xff]  }
  0x1c   : > { %v374_v24 = vmul.f32 %v2416_v9, %v2736_v3  ;;  %v375_v25 = vmul.f32 %v2736_v3, %v353_v17  ;;  %v619_v26 = vmul.f32 %v2415_v8, %v2741_v4  ;;  %v620_v27 = vmul.f32 %v2416_v9, %v2741_v4 }
  0x1d   : > { %v470_v29 = vrot.slane %v373_v23, 1  ;;  %v621_v30 = vmul.f32 %v2741_v4, %v353_v17  ;;  %v867_v31 = vmul.f32 %v2762_v19, %v2749_v13  ;;  %v868_v32 = vmul.f32 %v2762_v19, %v2751_v14 }
  0x1e   : > { %v471_v34 = vrot.slane %v374_v24, 1  ;;  %v473_v35 = vrot.slane %v375_v25, 1  ;;  %v716_v36 = vrot.slane %v619_v26, 2  ;;  %v717_v37 = vrot.slane %v620_v27, 2 }
  0x1f   : > { %v719_v38 = vrot.slane %v621_v30, 2  ;;  %v937_v39 = vmul.f32 %v2776_v28, %v2749_v13  ;;  %v938_v40 = vmul.f32 %v2776_v28, %v2751_v14  ;;  %v939_v41 = vmul.f32 %v2776_v28, %v2757_v18 }
  0x20   : > { %v472_v42 = vsel %vm469_vm0, %v470_v29, %v471_v34  ;;  %v474_v43 = vsel %vm469_vm0, %v471_v34, %v473_v35  ;;  %v718_v44 = vsel %vm715_vm1, %v716_v36, %v717_v37  ;;  %v1182_v45 = vmul.f32 %v2786_v33, %v2749_v13  ;;  %v2453_v29 = vld [vmem:[%s2726_s9 + $0x78] sm:$0xff]   ;;  %v224_v35 = vld [vmem:[%s2726_s9 + $0x6c] sm:$0xff]  }
  0x21   : > { %v582_v47 = vadd.f32 %v472_v42, %v288_v20  ;;  %v583_v48 = vadd.f32 %v474_v43, %v289_v21  ;;  %v720_v49 = vsel %vm715_vm1, %v717_v37, %v719_v38  ;;  %v1033_v50 = vrot.slane %v937_v39, 1  ;;  %v223_v43 = vld [vmem:[%s2726_s9 + $0x68] sm:$0x1] }
  0x22   : > { %v1034_v51 = vrot.slane %v938_v40, 1  ;;  %v1036_v52 = vrot.slane %v939_v41, 1  ;;  %v1183_v53 = vmul.f32 %v2786_v33, %v2751_v14  ;;  %v1184_v54 = vmul.f32 %v2786_v33, %v2757_v18 }
  0x23   : > { %v828_v56 = vadd.f32 %v718_v44, %v582_v47  ;;  %v829_v57 = vadd.f32 %v720_v49, %v583_v48  ;;  %v1278_v58 = vrot.slane %v1182_v45, 2  ;;  %v1429_v59 = vmul.f32 %v2753_v15, %v2802_v46  ;;  %v226_v44 = vld [vmem:[%s2726_s9 + $0x74] sm:$0x1]  ;;  %v229_v47 = vld [vmem:[%s2726_s9 + $0x80] sm:$0x1] }
  0x24   : > { %v1035_v60 = vsel %vm469_vm0, %v1033_v50, %v1034_v51  ;;  %v1037_v61 = vsel %vm469_vm0, %v1034_v51, %v1036_v52  ;;  %v1279_v62 = vrot.slane %v1183_v53, 2  ;;  %v1281_v63 = vrot.slane %v1184_v54, 2 }
  0x25   : > { %v899_v1 = vadd.f32 %v867_v31, %v828_v56  ;;  %v900_v5 = vadd.f32 %v868_v32, %v829_v57  ;;  %v1430_v6 = vmul.f32 %v2755_v16, %v2802_v46  ;;  %v1499_v7 = vmul.f32 %v2753_v15, %v2812_v55 }
  0x26   : > { %v1280_v8 = vsel %vm715_vm1, %v1278_v58, %v1279_v62  ;;  %v1282_v9 = vsel %vm715_vm1, %v1279_v62, %v1281_v63  ;;  %v1500_v10 = vmul.f32 %v2755_v16, %v2812_v55  ;;  %v1501_v11 = vmul.f32 %v2812_v55, %v2766_v22 }
  0x27   : > { %v1145_v17 = vadd.f32 %v1035_v60, %v899_v1  ;;  %v1146_v20 = vadd.f32 %v1037_v61, %v900_v5  ;;  %v1595_v21 = vrot.slane %v1499_v7, 1  ;;  %v1744_v23 = vmul.f32 %v2753_v15, %v2821_v0 }
  0x28   : > { %v1596_v24 = vrot.slane %v1500_v10, 1  ;;  %v1598_v25 = vrot.slane %v1501_v11, 1  ;;  %v1745_v26 = vmul.f32 %v2755_v16, %v2821_v0  ;;  %v1746_v27 = vmul.f32 %v2821_v0, %v2766_v22 }
  0x29   : > { %v1390_v30 = vadd.f32 %v1280_v8, %v1145_v17  ;;  %v1391_v31 = vadd.f32 %v1282_v9, %v1146_v20  ;;  %v1840_v32 = vrot.slane %v1744_v23, 2  ;;  %v2841_v34 = vunpack.c.l.bf16 %v2452_v12 }
  0x2a   : > { %v1597_v36 = vsel %vm469_vm0, %v1595_v21, %v1596_v24  ;;  %v1599_v37 = vsel %vm469_vm0, %v1596_v24, %v1598_v25  ;;  %v1841_v38 = vrot.slane %v1745_v26, 2  ;;  %v1843_v39 = vrot.slane %v1746_v27, 2 }
  0x2b   : > { %v1461_v40 = vadd.f32 %v1429_v59, %v1390_v30  ;;  %v1462_v41 = vadd.f32 %v1430_v6, %v1391_v31  ;;  %v2846_v42 = vunpack.c.h.bf16 %v2452_v12  ;;  %v2850_v45 = vunpack.c.l.bf16 %v2453_v29 }
  0x2c   : > { %v1842_v48 = vsel %vm715_vm1, %v1840_v32, %v1841_v38  ;;  %v1844_v49 = vsel %vm715_vm1, %v1841_v38, %v1843_v39  ;;  %v2855_v50 = vunpack.c.h.bf16 %v2453_v29  ;;  %v2857_v51 = vunpack.c.l.bf16 %v224_v35 }
  0x2d   : > { %v1707_v52 = vadd.f32 %v1597_v36, %v1461_v40  ;;  %v1708_v53 = vadd.f32 %v1599_v37, %v1462_v41  ;;  %v2859_v54 = vunpack.c.h.bf16 %v224_v35  ;;  %v304_v56 = vmul.f32 %v2841_v34, %v2731_v2 }
  0x2e   : > { %v305_v57 = vmul.f32 %v2846_v42, %v2731_v2  ;;  %v2865_v58 = vunpack.c.l.bf16 %v223_v43  ;;  %v2867_v59 = vunpack.c.l.bf16 %v226_v44  ;;  %v2869_v60 = vunpack.c.l.bf16 %v229_v47 }
  0x2f   : > { %v1952_v61 = vadd.f32 %v1842_v48, %v1707_v52  ;;  %v1953_v62 = vadd.f32 %v1844_v49, %v1708_v53  ;;  %v397_v63 = vmul.f32 %v2841_v34, %v2736_v3  ;;  %v398_v1 = vmul.f32 %v2846_v42, %v2736_v3 }
  0x30   : > { %v399_v5 = vmul.f32 %v2736_v3, %v2865_v58  ;;  %v643_v6 = vmul.f32 %v2841_v34, %v2741_v4  ;;  %v644_v7 = vmul.f32 %v2846_v42, %v2741_v4  ;;  %v645_v8 = vmul.f32 %v2741_v4, %v2865_v58 }
  0x31   : > { %v1984_v9 = vpack.c.bf16 %v1953_v62, %v1952_v61  ;;  %v510_v10 = vrot.slane %v397_v63, 1  ;;  %v511_v11 = vrot.slane %v398_v1, 1  ;;  %v883_v12 = vmul.f32 %v2762_v19, %v2857_v51 }
  0x32   : > { %v513_v17 = vrot.slane %v399_v5, 1  ;;  %v756_v20 = vrot.slane %v643_v6, 2  ;;  %v757_v21 = vrot.slane %v644_v7, 2  ;;  %v759_v23 = vrot.slane %v645_v8, 2 }
  0x33   : > { %2479 = vmatprep.mubr.msk.bf16.mxu0 %vm2023_vm2, %v1984_v9  ;;  %v512_v24 = vsel %vm469_vm0, %v510_v10, %v511_v11  ;;  %v884_v25 = vmul.f32 %v2762_v19, %v2859_v54  ;;  %v961_v26 = vmul.f32 %v2776_v28, %v2857_v51  ;;  %v962_v27 = vmul.f32 %v2776_v28, %v2859_v54  ;;  %v206_v9 = vld [vmem:[%s2726_s9 + $0x24] sm:$0xff]  }
  0x34   : > { %v514_v29 = vsel %vm469_vm0, %v511_v11, %v513_v17  ;;  %v598_v30 = vadd.f32 %v512_v24, %v304_v56  ;;  %v758_v31 = vsel %vm715_vm1, %v756_v20, %v757_v21  ;;  %v760_v32 = vsel %vm715_vm1, %v757_v21, %v759_v23 }
  0x35   : > { %v599_v35 = vadd.f32 %v514_v29, %v305_v57  ;;  %v963_v36 = vmul.f32 %v2776_v28, %v2867_v59  ;;  %v1073_v37 = vrot.slane %v961_v26, 1  ;;  %v1074_v38 = vrot.slane %v962_v27, 1 }
  0x36   : > { %v844_v39 = vadd.f32 %v758_v31, %v598_v30  ;;  %v1206_v40 = vmul.f32 %v2786_v33, %v2857_v51  ;;  %v1207_v41 = vmul.f32 %v2786_v33, %v2859_v54  ;;  %v1208_v43 = vmul.f32 %v2786_v33, %v2867_v59 }
  0x37   : > { %v845_v44 = vadd.f32 %v760_v32, %v599_v35  ;;  %v1075_v47 = vsel %vm469_vm0, %v1073_v37, %v1074_v38  ;;  %v1076_v48 = vrot.slane %v963_v36, 1  ;;  %v1445_v49 = vmul.f32 %v2850_v45, %v2802_v46  ;;  %v208_v36 = vld [vmem:[%s2726_s9 + $0x2c] sm:$0x1] }
  0x38   : > { %v915_v52 = vadd.f32 %v883_v12, %v844_v39  ;;  %v1318_v53 = vrot.slane %v1206_v40, 2  ;;  %v1319_v56 = vrot.slane %v1207_v41, 2  ;;  %v1321_v57 = vrot.slane %v1208_v43, 2 }
  0x39   : > { %v916_v61 = vadd.f32 %v884_v25, %v845_v44  ;;  %v1077_v62 = vsel %vm469_vm0, %v1074_v38, %v1076_v48  ;;  %v1446_v63 = vmul.f32 %v2855_v50, %v2802_v46  ;;  %v1523_v1 = vmul.f32 %v2850_v45, %v2812_v55 }
  0x3a   : > { %v1161_v5 = vadd.f32 %v1075_v47, %v915_v52  ;;  %v1320_v6 = vsel %vm715_vm1, %v1318_v53, %v1319_v56  ;;  %v1322_v7 = vsel %vm715_vm1, %v1319_v56, %v1321_v57  ;;  %v1524_v8 = vmul.f32 %v2855_v50, %v2812_v55 }
  0x3b   : > { %v1162_v10 = vadd.f32 %v1077_v62, %v916_v61  ;;  %v1525_v11 = vmul.f32 %v2812_v55, %v2869_v60  ;;  %v1635_v12 = vrot.slane %v1523_v1, 1  ;;  %v1768_v17 = vmul.f32 %v2850_v45, %v2821_v0 }
  0x3c   : > { %v1406_v20 = vadd.f32 %v1320_v6, %v1161_v5  ;;  %v1636_v21 = vrot.slane %v1524_v8, 1  ;;  %v1769_v23 = vmul.f32 %v2855_v50, %v2821_v0  ;;  %v1770_v24 = vmul.f32 %v2821_v0, %v2869_v60 }
  0x3d   : > { %v1407_v25 = vadd.f32 %v1322_v7, %v1162_v10  ;;  %v1638_v26 = vrot.slane %v1525_v11, 1  ;;  %v1880_v27 = vrot.slane %v1768_v17, 2  ;;  %v2925_v29 = vunpack.c.l.bf16 %v206_v9 }
  0x3e   : > { %v1477_v30 = vadd.f32 %v1445_v49, %v1406_v20  ;;  %v1637_v31 = vsel %vm469_vm0, %v1635_v12, %v1636_v21  ;;  %v1881_v32 = vrot.slane %v1769_v23, 2  ;;  %v1883_v35 = vrot.slane %v1770_v24, 2 }
  0x3f   : > { %v1478_v37 = vadd.f32 %v1446_v63, %v1407_v25  ;;  %v1639_v38 = vsel %vm469_vm0, %v1636_v21, %v1638_v26  ;;  %v2930_v39 = vunpack.c.h.bf16 %v206_v9  ;;  %v290_v40 = vmul.f32 %v2731_v2, %v2749_v13 }
  0x40   : > { %v1723_v41 = vadd.f32 %v1637_v31, %v1477_v30  ;;  %v1882_v43 = vsel %vm715_vm1, %v1880_v27, %v1881_v32  ;;  %v1884_v44 = vsel %vm715_vm1, %v1881_v32, %v1883_v35  ;;  %v291_v47 = vmul.f32 %v2731_v2, %v2751_v14 }
  0x41   : > { %v1724_v48 = vadd.f32 %v1639_v38, %v1478_v37  ;;  %v2938_v49 = vunpack.c.l.bf16 %v208_v36  ;;  %v376_v52 = vmul.f32 %v2736_v3, %v2749_v13  ;;  %v377_v53 = vmul.f32 %v2736_v3, %v2751_v14 }
  0x42   : > { %v1968_v56 = vadd.f32 %v1882_v43, %v1723_v41  ;;  %v378_v57 = vmul.f32 %v2736_v3, %v2757_v18  ;;  %v622_v61 = vmul.f32 %v2741_v4, %v2749_v13  ;;  %v623_v62 = vmul.f32 %v2741_v4, %v2751_v14 }
  0x43   : > { %v1969_v63 = vadd.f32 %v1884_v44, %v1724_v48  ;;  %v475_v1 = vrot.slane %v376_v52, 1  ;;  %v476_v5 = vrot.slane %v377_v53, 1  ;;  %v624_v6 = vmul.f32 %v2741_v4, %v2757_v18 }
  0x44   : > { %v478_v7 = vrot.slane %v378_v57, 1  ;;  %v721_v8 = vrot.slane %v622_v61, 2  ;;  %v722_v9 = vrot.slane %v623_v62, 2  ;;  %v869_v10 = vmul.f32 %v2753_v15, %v2762_v19 }
  0x45   : > { %v1992_v11 = vpack.c.bf16 %v1969_v63, %v1968_v56  ;;  %v477_v12 = vsel %vm469_vm0, %v475_v1, %v476_v5  ;;  %v724_v17 = vrot.slane %v624_v6, 2  ;;  %v870_v13 = vmul.f32 %v2755_v16, %v2762_v19 }
  0x46   : > { %v479_v14 = vsel %vm469_vm0, %v476_v5, %v478_v7  ;;  %v584_v20 = vadd.f32 %v477_v12, %v290_v40  ;;  %v723_v21 = vsel %vm715_vm1, %v721_v8, %v722_v9  ;;  %v940_v18 = vmul.f32 %v2753_v15, %v2776_v28  ;;  %v230_v7 = vld [vmem:[%s2726_s9 + $0x84] sm:$0xff]  }
  0x47   : > { %2495 = vmatprep.mubr.msk.bf16.mxu1 %vm2023_vm2, %v1992_v11  ;;  %v585_v23 = vadd.f32 %v479_v14, %v291_v47  ;;  %v725_v24 = vsel %vm715_vm1, %v722_v9, %v724_v17  ;;  %v941_v25 = vmul.f32 %v2755_v16, %v2776_v28  ;;  %v942_v26 = vmul.f32 %v2776_v28, %v2766_v22 }
  0x48   : > { %v830_v27 = vadd.f32 %v723_v21, %v584_v20  ;;  %v1038_v30 = vrot.slane %v940_v18, 1  ;;  %v1185_v31 = vmul.f32 %v2753_v15, %v2786_v33  ;;  %v1186_v32 = vmul.f32 %v2755_v16, %v2786_v33 }
  0x49   : > { %v831_v35 = vadd.f32 %v725_v24, %v585_v23  ;;  %v1039_v36 = vrot.slane %v941_v25, 1  ;;  %v1041_v37 = vrot.slane %v942_v26, 1  ;;  %v1187_v38 = vmul.f32 %v2786_v33, %v2766_v22  ;;  %v232_v23 = vld [vmem:[%s2726_s9 + $0x8c] sm:$0x1] }
  0x4a   : > { %v901_v40 = vadd.f32 %v869_v10, %v830_v27  ;;  %v1283_v41 = vrot.slane %v1185_v31, 2  ;;  %v1284_v43 = vrot.slane %v1186_v32, 2  ;;  %v1431_v44 = vmul.f32 %v2802_v46, %v2925_v29 }
  0x4b   : > { %v902_v47 = vadd.f32 %v870_v13, %v831_v35  ;;  %v1040_v48 = vsel %vm469_vm0, %v1038_v30, %v1039_v36  ;;  %v1042_v52 = vsel %vm469_vm0, %v1039_v36, %v1041_v37  ;;  %v1286_v53 = vrot.slane %v1187_v38, 2 }
  0x4c   : > { %v1147_v56 = vadd.f32 %v1040_v48, %v901_v40  ;;  %v1285_v57 = vsel %vm715_vm1, %v1283_v41, %v1284_v43  ;;  %v1432_v61 = vmul.f32 %v2802_v46, %v2930_v39  ;;  %v1502_v62 = vmul.f32 %v2812_v55, %v2925_v29 }
  0x4d   : > { %v1148_v63 = vadd.f32 %v1042_v52, %v902_v47  ;;  %v1287_v1 = vsel %vm715_vm1, %v1284_v43, %v1286_v53  ;;  %v1503_v5 = vmul.f32 %v2812_v55, %v2930_v39  ;;  %v1504_v6 = vmul.f32 %v2812_v55, %v2938_v49 }
  0x4e   : > { %v1392_v8 = vadd.f32 %v1285_v57, %v1147_v56  ;;  %v1600_v9 = vrot.slane %v1502_v62, 1  ;;  %v1747_v10 = vmul.f32 %v2821_v0, %v2925_v29  ;;  %v1748_v11 = vmul.f32 %v2821_v0, %v2930_v39 }
  0x4f   : > { %v1393_v12 = vadd.f32 %v1287_v1, %v1148_v63  ;;  %v1601_v17 = vrot.slane %v1503_v5, 1  ;;  %v1603_v13 = vrot.slane %v1504_v6, 1  ;;  %v1749_v14 = vmul.f32 %v2821_v0, %v2938_v49 }
  0x50   : > { %v1463_v20 = vadd.f32 %v1431_v44, %v1392_v8  ;;  %v1845_v21 = vrot.slane %v1747_v10, 2  ;;  %v1846_v18 = vrot.slane %v1748_v11, 2  ;;  %v2995_v24 = vunpack.c.l.bf16 %v230_v7 }
  0x51   : > { %v1464_v25 = vadd.f32 %v1432_v61, %v1393_v12  ;;  %v1602_v26 = vsel %vm469_vm0, %v1600_v9, %v1601_v17  ;;  %v1604_v27 = vsel %vm469_vm0, %v1601_v17, %v1603_v13  ;;  %v1848_v30 = vrot.slane %v1749_v14, 2 }
  0x52   : > { %v1709_v31 = vadd.f32 %v1602_v26, %v1463_v20  ;;  %v1847_v32 = vsel %vm715_vm1, %v1845_v21, %v1846_v18  ;;  %v3000_v35 = vunpack.c.h.bf16 %v230_v7  ;;  %v306_v36 = vmul.f32 %v2731_v2, %v2857_v51 }
  0x53   : > { %v1710_v37 = vadd.f32 %v1604_v27, %v1464_v25  ;;  %v1849_v38 = vsel %vm715_vm1, %v1846_v18, %v1848_v30  ;;  %v307_v40 = vmul.f32 %v2731_v2, %v2859_v54  ;;  %v3007_v41 = vunpack.c.l.bf16 %v232_v23 }
  0x54   : > { %v1954_v43 = vadd.f32 %v1847_v32, %v1709_v31  ;;  %v400_v44 = vmul.f32 %v2736_v3, %v2857_v51  ;;  %v401_v47 = vmul.f32 %v2736_v3, %v2859_v54  ;;  %v402_v48 = vmul.f32 %v2736_v3, %v2867_v59 }
  0x55   : > { %v1955_v52 = vadd.f32 %v1849_v38, %v1710_v37  ;;  %v646_v53 = vmul.f32 %v2741_v4, %v2857_v51  ;;  %v647_v56 = vmul.f32 %v2741_v4, %v2859_v54  ;;  %v648_v57 = vmul.f32 %v2741_v4, %v2867_v59 }
  0x56   : > { %v515_v61 = vrot.slane %v400_v44, 1  ;;  %v516_v62 = vrot.slane %v401_v47, 1  ;;  %v518_v63 = vrot.slane %v402_v48, 1  ;;  %v885_v1 = vmul.f32 %v2850_v45, %v2762_v19 }
  0x57   : > { %v1985_v5 = vpack.c.bf16 %v1955_v52, %v1954_v43  ;;  %v761_v6 = vrot.slane %v646_v53, 2  ;;  %v762_v7 = vrot.slane %v647_v56, 2  ;;  %v764_v8 = vrot.slane %v648_v57, 2 }
  0x58   : > { %v517_v9 = vsel %vm469_vm0, %v515_v61, %v516_v62  ;;  %v519_v10 = vsel %vm469_vm0, %v516_v62, %v518_v63  ;;  %v886_v11 = vmul.f32 %v2855_v50, %v2762_v19  ;;  %v964_v12 = vmul.f32 %v2850_v45, %v2776_v28 }
  0x59   : > { %2480 = vmatmul.mubr.msk.bf16.vlgmr.msra.gmra.mxu0 %vm2023_vm2, %v1985_v5  ;;  %v600_v17 = vadd.f32 %v517_v9, %v306_v36  ;;  %v601_v13 = vadd.f32 %v519_v10, %v307_v40  ;;  %v763_v14 = vsel %vm715_vm1, %v761_v6, %v762_v7  ;;  %v765_v20 = vsel %vm715_vm1, %v762_v7, %v764_v8 }
  0x5a   : > { %v965_v21 = vmul.f32 %v2855_v50, %v2776_v28  ;;  %v966_v18 = vmul.f32 %v2776_v28, %v2869_v60  ;;  %v1078_v23 = vrot.slane %v964_v12, 1  ;;  %v1209_v25 = vmul.f32 %v2850_v45, %v2786_v33 }
  0x5b   : > { %v846_v26 = vadd.f32 %v763_v14, %v600_v17  ;;  %v847_v27 = vadd.f32 %v765_v20, %v601_v13  ;;  %v1210_v30 = vmul.f32 %v2855_v50, %v2786_v33  ;;  %v1211_v31 = vmul.f32 %v2786_v33, %v2869_v60 }
  0x5c   : > { %v1079_v32 = vrot.slane %v965_v21, 1  ;;  %v1081_v36 = vrot.slane %v966_v18, 1  ;;  %v1323_v37 = vrot.slane %v1209_v25, 2  ;;  %v1447_v38 = vmul.f32 %v2802_v46, %v2995_v24 }
  0x5d   : > { %v917_v40 = vadd.f32 %v885_v1, %v846_v26  ;;  %v918_v43 = vadd.f32 %v886_v11, %v847_v27  ;;  %v1324_v44 = vrot.slane %v1210_v30, 2  ;;  %v1326_v47 = vrot.slane %v1211_v31, 2  ;;  %v2450_v1 = vld [vmem:[%s2726_s9 + $0x30] sm:$0xff]   ;;  %v211_v26 = vld [vmem:[%s2726_s9 + $0x38] sm:$0x1] }
  0x5e   : > { %v1080_v48 = vsel %vm469_vm0, %v1078_v23, %v1079_v32  ;;  %v1082_v52 = vsel %vm469_vm0, %v1079_v32, %v1081_v36  ;;  %v1448_v53 = vmul.f32 %v2802_v46, %v3000_v35  ;;  %v1526_v56 = vmul.f32 %v2812_v55, %v2995_v24 }
  0x5f   : > { %v1163_v57 = vadd.f32 %v1080_v48, %v917_v40  ;;  %v1164_v61 = vadd.f32 %v1082_v52, %v918_v43  ;;  %v1325_v62 = vsel %vm715_vm1, %v1323_v37, %v1324_v44  ;;  %v1327_v63 = vsel %vm715_vm1, %v1324_v44, %v1326_v47 }
  0x60   : > { %v1527_v5 = vmul.f32 %v2812_v55, %v3000_v35  ;;  %v1528_v6 = vmul.f32 %v2812_v55, %v3007_v41  ;;  %v1640_v7 = vrot.slane %v1526_v56, 1  ;;  %v1771_v8 = vmul.f32 %v2821_v0, %v2995_v24 }
  0x61   : > { %v1408_v9 = vadd.f32 %v1325_v62, %v1163_v57  ;;  %v1409_v10 = vadd.f32 %v1327_v63, %v1164_v61  ;;  %v1772_v11 = vmul.f32 %v2821_v0, %v3000_v35  ;;  %v1773_v12 = vmul.f32 %v2821_v0, %v3007_v41 }
  0x62   : > { %v1641_v17 = vrot.slane %v1527_v5, 1  ;;  %v1643_v13 = vrot.slane %v1528_v6, 1  ;;  %v1885_v14 = vrot.slane %v1771_v8, 2  ;;  %v3063_v20 = vunpack.c.l.bf16 %v2450_v1 }
  0x63   : > { %v1479_v21 = vadd.f32 %v1447_v38, %v1408_v9  ;;  %v1480_v18 = vadd.f32 %v1448_v53, %v1409_v10  ;;  %v1886_v23 = vrot.slane %v1772_v11, 2  ;;  %v1888_v25 = vrot.slane %v1773_v12, 2 }
  0x64   : > { %v1642_v27 = vsel %vm469_vm0, %v1640_v7, %v1641_v17  ;;  %v1644_v30 = vsel %vm469_vm0, %v1641_v17, %v1643_v13  ;;  %v3068_v31 = vunpack.c.h.bf16 %v2450_v1  ;;  %v292_v32 = vmul.f32 %v2753_v15, %v2731_v2 }
  0x65   : > { %v1725_v36 = vadd.f32 %v1642_v27, %v1479_v21  ;;  %v1726_v37 = vadd.f32 %v1644_v30, %v1480_v18  ;;  %v1887_v40 = vsel %vm715_vm1, %v1885_v14, %v1886_v23  ;;  %v1889_v43 = vsel %vm715_vm1, %v1886_v23, %v1888_v25 }
  0x66   : > { %v293_v38 = vmul.f32 %v2755_v16, %v2731_v2  ;;  %v3076_v44 = vunpack.c.l.bf16 %v211_v26  ;;  %v379_v47 = vmul.f32 %v2753_v15, %v2736_v3  ;;  %v380_v48 = vmul.f32 %v2755_v16, %v2736_v3 }
  0x67   : > { %v1970_v52 = vadd.f32 %v1887_v40, %v1725_v36  ;;  %v1971_v53 = vadd.f32 %v1889_v43, %v1726_v37  ;;  %v381_v56 = vmul.f32 %v2736_v3, %v2766_v22  ;;  %v625_v57 = vmul.f32 %v2753_v15, %v2741_v4 }
  0x68   : > { %v480_v61 = vrot.slane %v379_v47, 1  ;;  %v481_v62 = vrot.slane %v380_v48, 1  ;;  %v626_v63 = vmul.f32 %v2755_v16, %v2741_v4  ;;  %v627_v1 = vmul.f32 %v2741_v4, %v2766_v22 }
  0x69   : > { %v1993_v5 = vpack.c.bf16 %v1971_v53, %v1970_v52  ;;  %v483_v6 = vrot.slane %v381_v56, 1  ;;  %v726_v7 = vrot.slane %v625_v57, 2  ;;  %v871_v8 = vmul.f32 %v2762_v19, %v2925_v29 }
  0x6a   : > { %v482_v9 = vsel %vm469_vm0, %v480_v61, %v481_v62  ;;  %v727_v10 = vrot.slane %v626_v63, 2  ;;  %v729_v11 = vrot.slane %v627_v1, 2  ;;  %v872_v15 = vmul.f32 %v2762_v19, %v2930_v39 }
  0x6b   : > { %2496 = vmatmul.mubr.msk.bf16.vlgmr.msra.gmra.mxu1 %vm2023_vm2, %v1993_v5  ;;  %v484_v16 = vsel %vm469_vm0, %v481_v62, %v483_v6  ;;  %v586_v12 = vadd.f32 %v482_v9, %v292_v32  ;;  %v943_v22 = vmul.f32 %v2776_v28, %v2925_v29  ;;  %v944_v17 = vmul.f32 %v2776_v28, %v2930_v39 }
  0x6c   : > { %v587_v13 = vadd.f32 %v484_v16, %v293_v38  ;;  %v728_v14 = vsel %vm715_vm1, %v726_v7, %v727_v10  ;;  %v730_v21 = vsel %vm715_vm1, %v727_v10, %v729_v11  ;;  %v945_v18 = vmul.f32 %v2776_v28, %v2938_v49 }
  0x6d   : > { %v832_v23 = vadd.f32 %v728_v14, %v586_v12  ;;  %v1043_v25 = vrot.slane %v943_v22, 1  ;;  %v1044_v26 = vrot.slane %v944_v17, 1  ;;  %v1188_v27 = vmul.f32 %v2786_v33, %v2925_v29 }
  0x6e   : > { %v833_v30 = vadd.f32 %v730_v21, %v587_v13  ;;  %v1046_v32 = vrot.slane %v945_v18, 1  ;;  %v1189_v36 = vmul.f32 %v2786_v33, %v2930_v39  ;;  %v1190_v37 = vmul.f32 %v2786_v33, %v2938_v49 }
  0x6f   : > { %v903_v40 = vadd.f32 %v871_v8, %v832_v23  ;;  %v1045_v43 = vsel %vm469_vm0, %v1043_v25, %v1044_v26  ;;  %v1288_v38 = vrot.slane %v1188_v27, 2  ;;  %v1433_v47 = vmul.f32 %v3063_v20, %v2802_v46  ;;  %v2454_v8 = vld [vmem:[%s2726_s9 + $0x90] sm:$0xff]   ;;  %v235_v23 = vld [vmem:[%s2726_s9 + $0x98] sm:$0x1] }
  0x70   : > { %v904_v48 = vadd.f32 %v872_v15, %v833_v30  ;;  %v1047_v52 = vsel %vm469_vm0, %v1044_v26, %v1046_v32  ;;  %v1289_v53 = vrot.slane %v1189_v36, 2  ;;  %v1291_v56 = vrot.slane %v1190_v37, 2 }
  0x71   : > { %v1149_v57 = vadd.f32 %v1045_v43, %v903_v40  ;;  %v1434_v61 = vmul.f32 %v3068_v31, %v2802_v46  ;;  %v1505_v62 = vmul.f32 %v3063_v20, %v2812_v55  ;;  %v1506_v63 = vmul.f32 %v3068_v31, %v2812_v55 }
  0x72   : > { %v1150_v1 = vadd.f32 %v1047_v52, %v904_v48  ;;  %v1290_v5 = vsel %vm715_vm1, %v1288_v38, %v1289_v53  ;;  %v1292_v6 = vsel %vm715_vm1, %v1289_v53, %v1291_v56  ;;  %v1507_v7 = vmul.f32 %v2812_v55, %v3076_v44 }
  0x73   : > { %v1394_v9 = vadd.f32 %v1290_v5, %v1149_v57  ;;  %v1605_v10 = vrot.slane %v1505_v62, 1  ;;  %v1606_v11 = vrot.slane %v1506_v63, 1  ;;  %v1750_v15 = vmul.f32 %v3063_v20, %v2821_v0 }
  0x74   : > { %v1395_v16 = vadd.f32 %v1292_v6, %v1150_v1  ;;  %v1608_v12 = vrot.slane %v1507_v7, 1  ;;  %v1751_v22 = vmul.f32 %v3068_v31, %v2821_v0  ;;  %v1752_v17 = vmul.f32 %v2821_v0, %v3076_v44 }
  0x75   : > { %v1465_v13 = vadd.f32 %v1433_v47, %v1394_v9  ;;  %v1607_v14 = vsel %vm469_vm0, %v1605_v10, %v1606_v11  ;;  %v1850_v21 = vrot.slane %v1750_v15, 2  ;;  %v3133_v18 = vunpack.c.l.bf16 %v2454_v8 }
  0x76   : > { %v1466_v25 = vadd.f32 %v1434_v61, %v1395_v16  ;;  %v1609_v26 = vsel %vm469_vm0, %v1606_v11, %v1608_v12  ;;  %v1851_v27 = vrot.slane %v1751_v22, 2  ;;  %v1853_v30 = vrot.slane %v1752_v17, 2 }
  0x77   : > { %v1711_v32 = vadd.f32 %v1607_v14, %v1465_v13  ;;  %v3137_v36 = vunpack.c.h.bf16 %v2454_v8  ;;  %v308_v37 = vmul.f32 %v2850_v45, %v2731_v2  ;;  %v309_v40 = vmul.f32 %v2855_v50, %v2731_v2 }
  0x78   : > { %v1712_v43 = vadd.f32 %v1609_v26, %v1466_v25  ;;  %v1852_v38 = vsel %vm715_vm1, %v1850_v21, %v1851_v27  ;;  %v1854_v47 = vsel %vm715_vm1, %v1851_v27, %v1853_v30  ;;  %v3145_v48 = vunpack.c.l.bf16 %v235_v23 }
  0x79   : > { %v1956_v52 = vadd.f32 %v1852_v38, %v1711_v32  ;;  %v403_v53 = vmul.f32 %v2850_v45, %v2736_v3  ;;  %v404_v56 = vmul.f32 %v2855_v50, %v2736_v3  ;;  %v405_v57 = vmul.f32 %v2736_v3, %v2869_v60 }
  0x7a   : > { %v1957_v61 = vadd.f32 %v1854_v47, %v1712_v43  ;;  %v649_v62 = vmul.f32 %v2850_v45, %v2741_v4  ;;  %v650_v63 = vmul.f32 %v2855_v50, %v2741_v4  ;;  %v651_v1 = vmul.f32 %v2741_v4, %v2869_v60 }
  0x7b   : > { %v520_v5 = vrot.slane %v403_v53, 1  ;;  %v521_v6 = vrot.slane %v404_v56, 1  ;;  %v523_v7 = vrot.slane %v405_v57, 1  ;;  %v887_v8 = vmul.f32 %v2762_v19, %v2995_v24 }
  0x7c   : > { %v1986_v9 = vpack.c.bf16 %v1957_v61, %v1956_v52  ;;  %v766_v10 = vrot.slane %v649_v62, 2  ;;  %v767_v11 = vrot.slane %v650_v63, 2  ;;  %v769_v15 = vrot.slane %v651_v1, 2 }
  0x7d   : > { %v522_v16 = vsel %vm469_vm0, %v520_v5, %v521_v6  ;;  %v524_v45 = vsel %vm469_vm0, %v521_v6, %v523_v7  ;;  %v888_v50 = vmul.f32 %v2762_v19, %v3000_v35  ;;  %v967_v60 = vmul.f32 %v2776_v28, %v2995_v24 }
  0x7e   : > { %2483 = vmatprep.mubr.msk.bf16.mxu0 %vm2023_vm2, %v1986_v9  ;;  %v602_v12 = vadd.f32 %v522_v16, %v308_v37  ;;  %v603_v22 = vadd.f32 %v524_v45, %v309_v40  ;;  %v768_v17 = vsel %vm715_vm1, %v766_v10, %v767_v11  ;;  %v770_v13 = vsel %vm715_vm1, %v767_v11, %v769_v15 }
  0x7f   : > { %v968_v14 = vmul.f32 %v2776_v28, %v3000_v35  ;;  %v969_v21 = vmul.f32 %v2776_v28, %v3007_v41  ;;  %v1083_v23 = vrot.slane %v967_v60, 1  ;;  %v1212_v25 = vmul.f32 %v2786_v33, %v2995_v24 }
  0x80   : > { %v848_v26 = vadd.f32 %v768_v17, %v602_v12  ;;  %v849_v27 = vadd.f32 %v770_v13, %v603_v22  ;;  %v1213_v30 = vmul.f32 %v2786_v33, %v3000_v35  ;;  %v1214_v32 = vmul.f32 %v2786_v33, %v3007_v41 }
  0x81   : > { %v1084_v37 = vrot.slane %v968_v14, 1  ;;  %v1086_v40 = vrot.slane %v969_v21, 1  ;;  %v1328_v43 = vrot.slane %v1212_v25, 2  ;;  %v1449_v38 = vmul.f32 %v3133_v18, %v2802_v46 }
  0x82   : > { %v919_v47 = vadd.f32 %v887_v8, %v848_v26  ;;  %v920_v52 = vadd.f32 %v888_v50, %v849_v27  ;;  %v1329_v53 = vrot.slane %v1213_v30, 2  ;;  %v1331_v56 = vrot.slane %v1214_v32, 2  ;;  %v212_v8 = vld [vmem:[%s2726_s9 + $0x3c] sm:$0xff]   ;;  %v214_v26 = vld [vmem:[%s2726_s9 + $0x44] sm:$0x1] }
  0x83   : > { %v1085_v57 = vsel %vm469_vm0, %v1083_v23, %v1084_v37  ;;  %v1087_v61 = vsel %vm469_vm0, %v1084_v37, %v1086_v40  ;;  %v1450_v62 = vmul.f32 %v3137_v36, %v2802_v46  ;;  %v1529_v63 = vmul.f32 %v3133_v18, %v2812_v55 }
  0x84   : > { %v1165_v1 = vadd.f32 %v1085_v57, %v919_v47  ;;  %v1166_v5 = vadd.f32 %v1087_v61, %v920_v52  ;;  %v1330_v6 = vsel %vm715_vm1, %v1328_v43, %v1329_v53  ;;  %v1332_v7 = vsel %vm715_vm1, %v1329_v53, %v1331_v56 }
  0x85   : > { %v1530_v9 = vmul.f32 %v3137_v36, %v2812_v55  ;;  %v1531_v10 = vmul.f32 %v2812_v55, %v3145_v48  ;;  %v1645_v11 = vrot.slane %v1529_v63, 1  ;;  %v1774_v15 = vmul.f32 %v3133_v18, %v2821_v0 }
  0x86   : > { %v1410_v16 = vadd.f32 %v1330_v6, %v1165_v1  ;;  %v1411_v45 = vadd.f32 %v1332_v7, %v1166_v5  ;;  %v1775_v50 = vmul.f32 %v3137_v36, %v2821_v0  ;;  %v1776_v60 = vmul.f32 %v2821_v0, %v3145_v48 }
  0x87   : > { %v1646_v12 = vrot.slane %v1530_v9, 1  ;;  %v1648_v22 = vrot.slane %v1531_v10, 1  ;;  %v1890_v17 = vrot.slane %v1774_v15, 2  ;;  %v3201_v13 = vunpack.c.l.bf16 %v212_v8 }
  0x88   : > { %v1481_v14 = vadd.f32 %v1449_v38, %v1410_v16  ;;  %v1482_v21 = vadd.f32 %v1450_v62, %v1411_v45  ;;  %v1891_v23 = vrot.slane %v1775_v50, 2  ;;  %v1893_v25 = vrot.slane %v1776_v60, 2 }
  0x89   : > { %v1647_v27 = vsel %vm469_vm0, %v1645_v11, %v1646_v12  ;;  %v1649_v30 = vsel %vm469_vm0, %v1646_v12, %v1648_v22  ;;  %v3206_v32 = vunpack.c.h.bf16 %v212_v8  ;;  %v294_v37 = vmul.f32 %v2731_v2, %v2925_v29 }
  0x8a   : > { %v1727_v40 = vadd.f32 %v1647_v27, %v1481_v14  ;;  %v1728_v43 = vadd.f32 %v1649_v30, %v1482_v21  ;;  %v1892_v47 = vsel %vm715_vm1, %v1890_v17, %v1891_v23  ;;  %v1894_v52 = vsel %vm715_vm1, %v1891_v23, %v1893_v25 }
  0x8b   : > { %v295_v38 = vmul.f32 %v2731_v2, %v2930_v39  ;;  %v3214_v53 = vunpack.c.l.bf16 %v214_v26  ;;  %v382_v56 = vmul.f32 %v2736_v3, %v2925_v29  ;;  %v383_v57 = vmul.f32 %v2736_v3, %v2930_v39 }
  0x8c   : > { %v1972_v61 = vadd.f32 %v1892_v47, %v1727_v40  ;;  %v1973_v62 = vadd.f32 %v1894_v52, %v1728_v43  ;;  %v384_v63 = vmul.f32 %v2736_v3, %v2938_v49  ;;  %v628_v1 = vmul.f32 %v2741_v4, %v2925_v29 }
  0x8d   : > { %v485_v5 = vrot.slane %v382_v56, 1  ;;  %v486_v6 = vrot.slane %v383_v57, 1  ;;  %v629_v2 = vmul.f32 %v2741_v4, %v2930_v39  ;;  %v630_v7 = vmul.f32 %v2741_v4, %v2938_v49 }
  0x8e   : > { %v1994_v8 = vpack.c.bf16 %v1973_v62, %v1972_v61  ;;  %v488_v9 = vrot.slane %v384_v63, 1  ;;  %v731_v10 = vrot.slane %v628_v1, 2  ;;  %v873_v11 = vmul.f32 %v3063_v20, %v2762_v19 }
  0x8f   : > { %v487_v15 = vsel %vm469_vm0, %v485_v5, %v486_v6  ;;  %v732_v3 = vrot.slane %v629_v2, 2  ;;  %v734_v16 = vrot.slane %v630_v7, 2  ;;  %v874_v29 = vmul.f32 %v3068_v31, %v2762_v19 }
  0x90   : > { %2499 = vmatprep.mubr.msk.bf16.mxu1 %vm2023_vm2, %v1994_v8  ;;  %v489_v39 = vsel %vm469_vm0, %v486_v6, %v488_v9  ;;  %v588_v45 = vadd.f32 %v487_v15, %v294_v37  ;;  %v946_v4 = vmul.f32 %v3063_v20, %v2776_v28  ;;  %v947_v49 = vmul.f32 %v3068_v31, %v2776_v28  ;;  %v236_v6 = vld [vmem:[%s2726_s9 + $0x9c] sm:$0xff]  }
  0x91   : > { %v589_v50 = vadd.f32 %v489_v39, %v295_v38  ;;  %v733_v60 = vsel %vm715_vm1, %v731_v10, %v732_v3  ;;  %v735_v12 = vsel %vm715_vm1, %v732_v3, %v734_v16  ;;  %v948_v22 = vmul.f32 %v2776_v28, %v3076_v44 }
  0x92   : > { %v834_v19 = vadd.f32 %v733_v60, %v588_v45  ;;  %v1048_v17 = vrot.slane %v946_v4, 1  ;;  %v1049_v14 = vrot.slane %v947_v49, 1  ;;  %v1191_v21 = vmul.f32 %v3063_v20, %v2786_v33 }
  0x93   : > { %v835_v23 = vadd.f32 %v735_v12, %v589_v50  ;;  %v1051_v25 = vrot.slane %v948_v22, 1  ;;  %v1192_v26 = vmul.f32 %v3068_v31, %v2786_v33  ;;  %v1193_v27 = vmul.f32 %v2786_v33, %v3076_v44  ;;  %v3280_v22 = vld [vmem:[%s4081_s1] ss:$0 sm:$0xff] }
  0x94   : > { %v905_v30 = vadd.f32 %v873_v11, %v834_v19  ;;  %v1050_v37 = vsel %vm469_vm0, %v1048_v17, %v1049_v14  ;;  %v1293_v40 = vrot.slane %v1191_v21, 2  ;;  %v1435_v28 = vmul.f32 %v2802_v46, %v3201_v13 }
  0x95   : > { %v906_v43 = vadd.f32 %v874_v29, %v835_v23  ;;  %v1052_v47 = vsel %vm469_vm0, %v1049_v14, %v1051_v25  ;;  %v1294_v52 = vrot.slane %v1192_v26, 2  ;;  %v1296_v38 = vrot.slane %v1193_v27, 2  ;;  %v3293_v26 = vld [vmem:[%s4081_s1 + $0x1] ss:$0 sm:$0xff] }
  0x96   : > { %v1151_v56 = vadd.f32 %v1050_v37, %v905_v30  ;;  %v1436_v57 = vmul.f32 %v2802_v46, %v3206_v32  ;;  %v1508_v33 = vmul.f32 %v2812_v55, %v3201_v13  ;;  %v1509_v61 = vmul.f32 %v2812_v55, %v3206_v32 }
  0x97   : > { %v1152_v62 = vadd.f32 %v1052_v47, %v906_v43  ;;  %v1295_v63 = vsel %vm715_vm1, %v1293_v40, %v1294_v52  ;;  %v1297_v1 = vsel %vm715_vm1, %v1294_v52, %v1296_v38  ;;  %v1510_v5 = vmul.f32 %v2812_v55, %v3214_v53  ;;  %v238_v55 = vld [vmem:[%s2726_s9 + $0xa4] sm:$0x1] }
  0x98   : > { %v1396_v2 = vadd.f32 %v1295_v63, %v1151_v56  ;;  %v1610_v7 = vrot.slane %v1508_v33, 1  ;;  %v1611_v8 = vrot.slane %v1509_v61, 1  ;;  %v1753_v46 = vmul.f32 %v2821_v0, %v3201_v13  ;;  %v3315_v33 = vld [vmem:[%s4081_s1 + $0x3] ss:$0 sm:$0xff] }
  0x99   : > { %v1397_v9 = vadd.f32 %v1297_v1, %v1152_v62  ;;  %v1613_v10 = vrot.slane %v1510_v5, 1  ;;  %v1754_v11 = vmul.f32 %v2821_v0, %v3206_v32  ;;  %v1755_v15 = vmul.f32 %v2821_v0, %v3214_v53 }
  0x9a   : > { %v1467_v3 = vadd.f32 %v1435_v28, %v1396_v2  ;;  %v1612_v16 = vsel %vm469_vm0, %v1610_v7, %v1611_v8  ;;  %v1855_v29 = vrot.slane %v1753_v46, 2  ;;  %v3272_v39 = vunpack.c.l.bf16 %v236_v6  ;;  %v3304_v28 = vld [vmem:[%s4081_s1 + $0x2] ss:$0 sm:$0xff] }
  0x9b   : > { %v1468_v45 = vadd.f32 %v1436_v57, %v1397_v9  ;;  %v1614_v4 = vsel %vm469_vm0, %v1611_v8, %v1613_v10  ;;  %v1856_v49 = vrot.slane %v1754_v11, 2  ;;  %v1858_v50 = vrot.slane %v1755_v15, 2 }
  0x9c   : > { %v1713_v60 = vadd.f32 %v1612_v16, %v1467_v3  ;;  %v3275_v12 = vunpack.c.h.bf16 %v236_v6  ;;  %v310_v0 = vmul.f32 %v3280_v22, %v2995_v24  ;;  %v311_v19 = vmul.f32 %v3280_v22, %v3000_v35  ;;  %v3326_v6 = vld [vmem:[%s4081_s1 + $0x4] ss:$0 sm:$0xff]  ;;  %v3340_v3 = vld [vmem:[%s4081_s1 + $0x5] ss:$0 sm:$0xff] }
  0x9d   : > { %v1714_v17 = vadd.f32 %v1614_v4, %v1468_v45  ;;  %v1857_v14 = vsel %vm715_vm1, %v1855_v29, %v1856_v49  ;;  %v1859_v21 = vsel %vm715_vm1, %v1856_v49, %v1858_v50  ;;  %v3288_v23 = vunpack.c.l.bf16 %v238_v55 }
  0x9e   : > { %v1958_v25 = vadd.f32 %v1857_v14, %v1713_v60  ;;  %v406_v27 = vmul.f32 %v3293_v26, %v2995_v24  ;;  %v407_v30 = vmul.f32 %v3293_v26, %v3000_v35  ;;  %v408_v37 = vmul.f32 %v3293_v26, %v3007_v41 }
  0x9f   : > { %v1959_v40 = vadd.f32 %v1859_v21, %v1714_v17  ;;  %v652_v43 = vmul.f32 %v3304_v28, %v2995_v24  ;;  %v653_v47 = vmul.f32 %v3304_v28, %v3000_v35  ;;  %v654_v52 = vmul.f32 %v3304_v28, %v3007_v41 }
  0xa0   : > { %v525_v38 = vrot.slane %v406_v27, 1  ;;  %v526_v56 = vrot.slane %v407_v30, 1  ;;  %v528_v57 = vrot.slane %v408_v37, 1  ;;  %v889_v61 = vmul.f32 %v3315_v33, %v3133_v18 }
  0xa1   : > { %v1987_v62 = vpack.c.bf16 %v1959_v40, %v1958_v25  ;;  %v771_v63 = vrot.slane %v652_v43, 2  ;;  %v772_v24 = vrot.slane %v653_v47, 2  ;;  %v774_v1 = vrot.slane %v654_v52, 2  ;;  %v3362_v40 = vld [vmem:[%s4081_s1 + $0x7] ss:$0 sm:$0xff] }
  0xa2   : > { %v527_v35 = vsel %vm469_vm0, %v525_v38, %v526_v56  ;;  %v529_v5 = vsel %vm469_vm0, %v526_v56, %v528_v57  ;;  %v890_v41 = vmul.f32 %v3315_v33, %v3137_v36  ;;  %v970_v2 = vmul.f32 %v3326_v6, %v3133_v18  ;;  %v2451_v57 = vld [vmem:[%s2726_s9 + $0x48] sm:$0xff]  }
  0xa3   : > { %2484 = vmatmul.mubr.msk.bf16.gmra.mxu0 %vm2023_vm2, %v1987_v62  ;;  %v604_v7 = vadd.f32 %v527_v35, %v310_v0  ;;  %v605_v8 = vadd.f32 %v529_v5, %v311_v19  ;;  %v773_v46 = vsel %vm715_vm1, %v771_v63, %v772_v24  ;;  %v775_v9 = vsel %vm715_vm1, %v772_v24, %v774_v1  ;;  %v3351_v0 = vld [vmem:[%s4081_s1 + $0x6] ss:$0 sm:$0xff]  ;;  %v3376_v24 = vld [vmem:[%s4081_s1 + $0x8] ss:$0 sm:$0xff] }
  0xa4   : > { %v971_v10 = vmul.f32 %v3326_v6, %v3137_v36  ;;  %v972_v11 = vmul.f32 %v3326_v6, %v3145_v48  ;;  %v1088_v15 = vrot.slane %v970_v2, 1  ;;  %v1215_v16 = vmul.f32 %v3340_v3, %v3133_v18 }
  0xa5   : > { %v850_v29 = vadd.f32 %v773_v46, %v604_v7  ;;  %v851_v55 = vadd.f32 %v775_v9, %v605_v8  ;;  %v1216_v45 = vmul.f32 %v3340_v3, %v3137_v36  ;;  %v1217_v4 = vmul.f32 %v3340_v3, %v3145_v48 }
  0xa6   : > { %v1089_v49 = vrot.slane %v971_v10, 1  ;;  %v1091_v50 = vrot.slane %v972_v11, 1  ;;  %v1333_v60 = vrot.slane %v1215_v16, 2  ;;  %v1451_v19 = vmul.f32 %v3351_v0, %v3272_v39 }
  0xa7   : > { %v921_v17 = vadd.f32 %v889_v61, %v850_v29  ;;  %v922_v14 = vadd.f32 %v890_v41, %v851_v55  ;;  %v1334_v21 = vrot.slane %v1216_v45, 2  ;;  %v1336_v25 = vrot.slane %v1217_v4, 2  ;;  %v217_v29 = vld [vmem:[%s2726_s9 + $0x50] sm:$0x1] }
  0xa8   : > { %v1090_v27 = vsel %vm469_vm0, %v1088_v15, %v1089_v49  ;;  %v1092_v30 = vsel %vm469_vm0, %v1089_v49, %v1091_v50  ;;  %v1452_v37 = vmul.f32 %v3351_v0, %v3275_v12  ;;  %v1532_v43 = vmul.f32 %v3362_v40, %v3272_v39 }
  0xa9   : > { %v1167_v47 = vadd.f32 %v1090_v27, %v921_v17  ;;  %v1168_v52 = vadd.f32 %v1092_v30, %v922_v14  ;;  %v1335_v38 = vsel %vm715_vm1, %v1333_v60, %v1334_v21  ;;  %v1337_v56 = vsel %vm715_vm1, %v1334_v21, %v1336_v25 }
  0xaa   : > { %v1533_v61 = vmul.f32 %v3362_v40, %v3275_v12  ;;  %v1534_v62 = vmul.f32 %v3362_v40, %v3288_v23  ;;  %v1650_v63 = vrot.slane %v1532_v43, 1  ;;  %v1777_v1 = vmul.f32 %v3376_v24, %v3272_v39 }
  0xab   : > { %v1412_v35 = vadd.f32 %v1335_v38, %v1167_v47  ;;  %v1413_v5 = vadd.f32 %v1337_v56, %v1168_v52  ;;  %v1778_v41 = vmul.f32 %v3376_v24, %v3275_v12  ;;  %v1779_v2 = vmul.f32 %v3376_v24, %v3288_v23 }
  0xac   : > { %v1651_v7 = vrot.slane %v1533_v61, 1  ;;  %v1653_v8 = vrot.slane %v1534_v62, 1  ;;  %v1895_v46 = vrot.slane %v1777_v1, 2  ;;  %v3384_v9 = vunpack.c.l.bf16 %v2451_v57 }
  0xad   : > { %v1483_v10 = vadd.f32 %v1451_v19, %v1412_v35  ;;  %v1484_v11 = vadd.f32 %v1452_v37, %v1413_v5  ;;  %v1896_v15 = vrot.slane %v1778_v41, 2  ;;  %v1898_v16 = vrot.slane %v1779_v2, 2 }
  0xae   : > { %v1652_v55 = vsel %vm469_vm0, %v1650_v63, %v1651_v7  ;;  %v1654_v45 = vsel %vm469_vm0, %v1651_v7, %v1653_v8  ;;  %v3389_v4 = vunpack.c.h.bf16 %v2451_v57  ;;  %v296_v49 = vmul.f32 %v3280_v22, %v3063_v20 }
  0xaf   : > { %v1729_v50 = vadd.f32 %v1652_v55, %v1483_v10  ;;  %v1730_v60 = vadd.f32 %v1654_v45, %v1484_v11  ;;  %v1897_v17 = vsel %vm715_vm1, %v1895_v46, %v1896_v15  ;;  %v1899_v14 = vsel %vm715_vm1, %v1896_v15, %v1898_v16 }
  0xb0   : > { %v297_v19 = vmul.f32 %v3280_v22, %v3068_v31  ;;  %v3397_v21 = vunpack.c.l.bf16 %v217_v29  ;;  %v385_v25 = vmul.f32 %v3293_v26, %v3063_v20  ;;  %v386_v27 = vmul.f32 %v3293_v26, %v3068_v31 }
  0xb1   : > { %v1974_v30 = vadd.f32 %v1897_v17, %v1729_v50  ;;  %v1975_v37 = vadd.f32 %v1899_v14, %v1730_v60  ;;  %v387_v43 = vmul.f32 %v3293_v26, %v3076_v44  ;;  %v631_v47 = vmul.f32 %v3304_v28, %v3063_v20 }
  0xb2   : > { %v490_v52 = vrot.slane %v385_v25, 1  ;;  %v491_v38 = vrot.slane %v386_v27, 1  ;;  %v632_v56 = vmul.f32 %v3304_v28, %v3068_v31  ;;  %v633_v57 = vmul.f32 %v3304_v28, %v3076_v44 }
  0xb3   : > { %v1995_v61 = vpack.c.bf16 %v1975_v37, %v1974_v30  ;;  %v493_v62 = vrot.slane %v387_v43, 1  ;;  %v736_v63 = vrot.slane %v631_v47, 2  ;;  %v875_v1 = vmul.f32 %v3315_v33, %v3201_v13 }
  0xb4   : > { %v492_v35 = vsel %vm469_vm0, %v490_v52, %v491_v38  ;;  %v737_v5 = vrot.slane %v632_v56, 2  ;;  %v739_v41 = vrot.slane %v633_v57, 2  ;;  %v876_v20 = vmul.f32 %v3315_v33, %v3206_v32 }
  0xb5   : > { %2500 = vmatmul.mubr.msk.bf16.gmra.mxu1 %vm2023_vm2, %v1995_v61  ;;  %v494_v31 = vsel %vm469_vm0, %v491_v38, %v493_v62  ;;  %v590_v2 = vadd.f32 %v492_v35, %v296_v49  ;;  %v949_v44 = vmul.f32 %v3326_v6, %v3201_v13  ;;  %v950_v7 = vmul.f32 %v3326_v6, %v3206_v32 }
  0xb6   : > { %v591_v8 = vadd.f32 %v494_v31, %v297_v19  ;;  %v738_v46 = vsel %vm715_vm1, %v736_v63, %v737_v5  ;;  %v740_v10 = vsel %vm715_vm1, %v737_v5, %v739_v41  ;;  %v951_v11 = vmul.f32 %v3326_v6, %v3214_v53 }
  0xb7   : > { %v836_v15 = vadd.f32 %v738_v46, %v590_v2  ;;  %v1053_v16 = vrot.slane %v949_v44, 1  ;;  %v1054_v29 = vrot.slane %v950_v7, 1  ;;  %v1194_v55 = vmul.f32 %v3340_v3, %v3201_v13 }
  0xb8   : > { %v837_v45 = vadd.f32 %v740_v10, %v591_v8  ;;  %v1056_v49 = vrot.slane %v951_v11, 1  ;;  %v1195_v50 = vmul.f32 %v3340_v3, %v3206_v32  ;;  %v1196_v60 = vmul.f32 %v3340_v3, %v3214_v53 }
  0xb9   : > { %v907_v17 = vadd.f32 %v875_v1, %v836_v15  ;;  %v1055_v14 = vsel %vm469_vm0, %v1053_v16, %v1054_v29  ;;  %v1298_v19 = vrot.slane %v1194_v55, 2  ;;  %v1437_v25 = vmul.f32 %v3351_v0, %v3384_v9  ;;  %v2455_v1 = vld [vmem:[%s2726_s9 + $0xa8] sm:$0xff]   ;;  %v241_v15 = vld [vmem:[%s2726_s9 + $0xb0] sm:$0x1] }
  0xba   : > { %v908_v27 = vadd.f32 %v876_v20, %v837_v45  ;;  %v1057_v30 = vsel %vm469_vm0, %v1054_v29, %v1056_v49  ;;  %v1299_v37 = vrot.slane %v1195_v50, 2  ;;  %v1301_v43 = vrot.slane %v1196_v60, 2 }
  0xbb   : > { %v1153_v47 = vadd.f32 %v1055_v14, %v907_v17  ;;  %v1438_v52 = vmul.f32 %v3351_v0, %v3389_v4  ;;  %v1511_v38 = vmul.f32 %v3362_v40, %v3384_v9  ;;  %v1512_v56 = vmul.f32 %v3362_v40, %v3389_v4 }
  0xbc   : > { %v1154_v57 = vadd.f32 %v1057_v30, %v908_v27  ;;  %v1300_v61 = vsel %vm715_vm1, %v1298_v19, %v1299_v37  ;;  %v1302_v62 = vsel %vm715_vm1, %v1299_v37, %v1301_v43  ;;  %v1513_v63 = vmul.f32 %v3362_v40, %v3397_v21 }
  0xbd   : > { %v1398_v35 = vadd.f32 %v1300_v61, %v1153_v47  ;;  %v1615_v5 = vrot.slane %v1511_v38, 1  ;;  %v1616_v41 = vrot.slane %v1512_v56, 1  ;;  %v1756_v20 = vmul.f32 %v3376_v24, %v3384_v9 }
  0xbe   : > { %v1399_v31 = vadd.f32 %v1302_v62, %v1154_v57  ;;  %v1618_v2 = vrot.slane %v1513_v63, 1  ;;  %v1757_v44 = vmul.f32 %v3376_v24, %v3389_v4  ;;  %v1758_v7 = vmul.f32 %v3376_v24, %v3397_v21 }
  0xbf   : > { %v1469_v8 = vadd.f32 %v1437_v25, %v1398_v35  ;;  %v1617_v46 = vsel %vm469_vm0, %v1615_v5, %v1616_v41  ;;  %v1860_v10 = vrot.slane %v1756_v20, 2  ;;  %v3454_v11 = vunpack.c.l.bf16 %v2455_v1 }
  0xc0   : > { %v1470_v16 = vadd.f32 %v1438_v52, %v1399_v31  ;;  %v1619_v29 = vsel %vm469_vm0, %v1616_v41, %v1618_v2  ;;  %v1861_v55 = vrot.slane %v1757_v44, 2  ;;  %v1863_v45 = vrot.slane %v1758_v7, 2 }
  0xc1   : > { %v1715_v49 = vadd.f32 %v1617_v46, %v1469_v8  ;;  %v3458_v50 = vunpack.c.h.bf16 %v2455_v1  ;;  %v312_v60 = vmul.f32 %v3280_v22, %v3133_v18  ;;  %v313_v17 = vmul.f32 %v3280_v22, %v3137_v36 }
  0xc2   : > { %v1716_v14 = vadd.f32 %v1619_v29, %v1470_v16  ;;  %v1862_v19 = vsel %vm715_vm1, %v1860_v10, %v1861_v55  ;;  %v1864_v25 = vsel %vm715_vm1, %v1861_v55, %v1863_v45  ;;  %v3466_v27 = vunpack.c.l.bf16 %v241_v15 }
  0xc3   : > { %v1960_v30 = vadd.f32 %v1862_v19, %v1715_v49  ;;  %v409_v37 = vmul.f32 %v3293_v26, %v3133_v18  ;;  %v410_v43 = vmul.f32 %v3293_v26, %v3137_v36  ;;  %v411_v47 = vmul.f32 %v3293_v26, %v3145_v48 }
  0xc4   : > { %v1961_v52 = vadd.f32 %v1864_v25, %v1716_v14  ;;  %v655_v38 = vmul.f32 %v3304_v28, %v3133_v18  ;;  %v656_v56 = vmul.f32 %v3304_v28, %v3137_v36  ;;  %v657_v57 = vmul.f32 %v3304_v28, %v3145_v48 }
  0xc5   : > { %v530_v61 = vrot.slane %v409_v37, 1  ;;  %v531_v62 = vrot.slane %v410_v43, 1  ;;  %v533_v63 = vrot.slane %v411_v47, 1  ;;  %v891_v1 = vmul.f32 %v3315_v33, %v3272_v39 }
  0xc6   : > { %v1988_v35 = vpack.c.bf16 %v1961_v52, %v1960_v30  ;;  %v776_v5 = vrot.slane %v655_v38, 2  ;;  %v777_v41 = vrot.slane %v656_v56, 2  ;;  %v779_v20 = vrot.slane %v657_v57, 2 }
  0xc7   : > { %v532_v31 = vsel %vm469_vm0, %v530_v61, %v531_v62  ;;  %v534_v18 = vsel %vm469_vm0, %v531_v62, %v533_v63  ;;  %v892_v36 = vmul.f32 %v3315_v33, %v3275_v12  ;;  %v973_v48 = vmul.f32 %v3326_v6, %v3272_v39 }
  0xc8   : > { %2487 = vmatprep.mubr.msk.bf16.mxu0 %vm2023_vm2, %v1988_v35  ;;  %v606_v2 = vadd.f32 %v532_v31, %v312_v60  ;;  %v607_v44 = vadd.f32 %v534_v18, %v313_v17  ;;  %v778_v7 = vsel %vm715_vm1, %v776_v5, %v777_v41  ;;  %v780_v8 = vsel %vm715_vm1, %v777_v41, %v779_v20 }
  0xc9   : > { %v974_v46 = vmul.f32 %v3326_v6, %v3275_v12  ;;  %v975_v10 = vmul.f32 %v3326_v6, %v3288_v23  ;;  %v1093_v15 = vrot.slane %v973_v48, 1  ;;  %v1218_v16 = vmul.f32 %v3340_v3, %v3272_v39 }
  0xca   : > { %v852_v29 = vadd.f32 %v778_v7, %v606_v2  ;;  %v853_v55 = vadd.f32 %v780_v8, %v607_v44  ;;  %v1219_v45 = vmul.f32 %v3340_v3, %v3275_v12  ;;  %v1220_v49 = vmul.f32 %v3340_v3, %v3288_v23 }
  0xcb   : > { %v1094_v60 = vrot.slane %v974_v46, 1  ;;  %v1096_v17 = vrot.slane %v975_v10, 1  ;;  %v1338_v14 = vrot.slane %v1218_v16, 2  ;;  %v1453_v19 = vmul.f32 %v3351_v0, %v3454_v11 }
  0xcc   : > { %v923_v25 = vadd.f32 %v891_v1, %v852_v29  ;;  %v924_v30 = vadd.f32 %v892_v36, %v853_v55  ;;  %v1339_v37 = vrot.slane %v1219_v45, 2  ;;  %v1341_v43 = vrot.slane %v1220_v49, 2  ;;  %v218_v1 = vld [vmem:[%s2726_s9 + $0x54] sm:$0xff]   ;;  %v220_v29 = vld [vmem:[%s2726_s9 + $0x5c] sm:$0x1] }
  0xcd   : > { %v1095_v47 = vsel %vm469_vm0, %v1093_v15, %v1094_v60  ;;  %v1097_v52 = vsel %vm469_vm0, %v1094_v60, %v1096_v17  ;;  %v1454_v38 = vmul.f32 %v3351_v0, %v3458_v50  ;;  %v1535_v56 = vmul.f32 %v3362_v40, %v3454_v11 }
  0xce   : > { %v1169_v57 = vadd.f32 %v1095_v47, %v923_v25  ;;  %v1170_v61 = vadd.f32 %v1097_v52, %v924_v30  ;;  %v1340_v62 = vsel %vm715_vm1, %v1338_v14, %v1339_v37  ;;  %v1342_v63 = vsel %vm715_vm1, %v1339_v37, %v1341_v43 }
  0xcf   : > { %v1536_v35 = vmul.f32 %v3362_v40, %v3458_v50  ;;  %v1537_v5 = vmul.f32 %v3362_v40, %v3466_v27  ;;  %v1655_v41 = vrot.slane %v1535_v56, 1  ;;  %v1780_v20 = vmul.f32 %v3376_v24, %v3454_v11 }
  0xd0   : > { %v1414_v31 = vadd.f32 %v1340_v62, %v1169_v57  ;;  %v1415_v18 = vadd.f32 %v1342_v63, %v1170_v61  ;;  %v1781_v36 = vmul.f32 %v3376_v24, %v3458_v50  ;;  %v1782_v48 = vmul.f32 %v3376_v24, %v3466_v27 }
  0xd1   : > { %v1656_v2 = vrot.slane %v1536_v35, 1  ;;  %v1658_v44 = vrot.slane %v1537_v5, 1  ;;  %v1900_v7 = vrot.slane %v1780_v20, 2  ;;  %v3522_v8 = vunpack.c.l.bf16 %v218_v1 }
  0xd2   : > { %v1485_v46 = vadd.f32 %v1453_v19, %v1414_v31  ;;  %v1486_v10 = vadd.f32 %v1454_v38, %v1415_v18  ;;  %v1901_v15 = vrot.slane %v1781_v36, 2  ;;  %v1903_v16 = vrot.slane %v1782_v48, 2 }
  0xd3   : > { %v1657_v55 = vsel %vm469_vm0, %v1655_v41, %v1656_v2  ;;  %v1659_v45 = vsel %vm469_vm0, %v1656_v2, %v1658_v44  ;;  %v3527_v49 = vunpack.c.h.bf16 %v218_v1  ;;  %v298_v60 = vmul.f32 %v3280_v22, %v3201_v13 }
  0xd4   : > { %v1731_v17 = vadd.f32 %v1657_v55, %v1485_v46  ;;  %v1732_v14 = vadd.f32 %v1659_v45, %v1486_v10  ;;  %v1902_v25 = vsel %vm715_vm1, %v1900_v7, %v1901_v15  ;;  %v1904_v30 = vsel %vm715_vm1, %v1901_v15, %v1903_v16 }
  0xd5   : > { %v299_v19 = vmul.f32 %v3280_v22, %v3206_v32  ;;  %v3535_v37 = vunpack.c.l.bf16 %v220_v29  ;;  %v388_v43 = vmul.f32 %v3293_v26, %v3201_v13  ;;  %v389_v47 = vmul.f32 %v3293_v26, %v3206_v32 }
  0xd6   : > { %v1976_v52 = vadd.f32 %v1902_v25, %v1731_v17  ;;  %v1977_v38 = vadd.f32 %v1904_v30, %v1732_v14  ;;  %v390_v56 = vmul.f32 %v3293_v26, %v3214_v53  ;;  %v634_v57 = vmul.f32 %v3304_v28, %v3201_v13 }
  0xd7   : > { %v495_v61 = vrot.slane %v388_v43, 1  ;;  %v496_v62 = vrot.slane %v389_v47, 1  ;;  %v635_v63 = vmul.f32 %v3304_v28, %v3206_v32  ;;  %v636_v1 = vmul.f32 %v3304_v28, %v3214_v53 }
  0xd8   : > { %v1996_v35 = vpack.c.bf16 %v1977_v38, %v1976_v52  ;;  %v498_v5 = vrot.slane %v390_v56, 1  ;;  %v741_v41 = vrot.slane %v634_v57, 2  ;;  %v877_v20 = vmul.f32 %v3315_v33, %v3384_v9 }
  0xd9   : > { %v497_v31 = vsel %vm469_vm0, %v495_v61, %v496_v62  ;;  %v742_v18 = vrot.slane %v635_v63, 2  ;;  %v744_v36 = vrot.slane %v636_v1, 2  ;;  %v878_v13 = vmul.f32 %v3315_v33, %v3389_v4 }
  0xda   : > { %2503 = vmatprep.mubr.msk.bf16.mxu1 %vm2023_vm2, %v1996_v35  ;;  %v499_v32 = vsel %vm469_vm0, %v496_v62, %v498_v5  ;;  %v592_v48 = vadd.f32 %v497_v31, %v298_v60  ;;  %v952_v53 = vmul.f32 %v3326_v6, %v3384_v9  ;;  %v953_v2 = vmul.f32 %v3326_v6, %v3389_v4 }
  0xdb   : > { %v593_v44 = vadd.f32 %v499_v32, %v299_v19  ;;  %v743_v7 = vsel %vm715_vm1, %v741_v41, %v742_v18  ;;  %v745_v46 = vsel %vm715_vm1, %v742_v18, %v744_v36  ;;  %v954_v10 = vmul.f32 %v3326_v6, %v3397_v21 }
  0xdc   : > { %v838_v15 = vadd.f32 %v743_v7, %v592_v48  ;;  %v1058_v16 = vrot.slane %v952_v53, 1  ;;  %v1059_v29 = vrot.slane %v953_v2, 1  ;;  %v1197_v55 = vmul.f32 %v3340_v3, %v3384_v9 }
  0xdd   : > { %v839_v45 = vadd.f32 %v745_v46, %v593_v44  ;;  %v1061_v60 = vrot.slane %v954_v10, 1  ;;  %v1198_v17 = vmul.f32 %v3340_v3, %v3389_v4  ;;  %v1199_v14 = vmul.f32 %v3340_v3, %v3397_v21  ;;  %v244_v10 = vld [vmem:[%s2726_s9 + $0xbc] sm:$0x1] }
  0xde   : > { %v909_v25 = vadd.f32 %v877_v20, %v838_v15  ;;  %v1060_v30 = vsel %vm469_vm0, %v1058_v16, %v1059_v29  ;;  %v1303_v19 = vrot.slane %v1197_v55, 2  ;;  %v1439_v43 = vmul.f32 %v3351_v0, %v3522_v8  ;;  %v242_v20 = vld [vmem:[%s2726_s9 + $0xb4] sm:$0xff]  }
  0xdf   : > { %v910_v47 = vadd.f32 %v878_v13, %v839_v45  ;;  %v1062_v52 = vsel %vm469_vm0, %v1059_v29, %v1061_v60  ;;  %v1304_v38 = vrot.slane %v1198_v17, 2  ;;  %v1306_v56 = vrot.slane %v1199_v14, 2 }
  0xe0   : > { %v1155_v57 = vadd.f32 %v1060_v30, %v909_v25  ;;  %v1440_v61 = vmul.f32 %v3351_v0, %v3527_v49  ;;  %v1514_v62 = vmul.f32 %v3362_v40, %v3522_v8  ;;  %v1515_v63 = vmul.f32 %v3362_v40, %v3527_v49 }
  0xe1   : > { %v1156_v1 = vadd.f32 %v1062_v52, %v910_v47  ;;  %v1305_v35 = vsel %vm715_vm1, %v1303_v19, %v1304_v38  ;;  %v1307_v5 = vsel %vm715_vm1, %v1304_v38, %v1306_v56  ;;  %v1516_v41 = vmul.f32 %v3362_v40, %v3535_v37 }
  0xe2   : > { %v1400_v31 = vadd.f32 %v1305_v35, %v1155_v57  ;;  %v1620_v18 = vrot.slane %v1514_v62, 1  ;;  %v1621_v36 = vrot.slane %v1515_v63, 1  ;;  %v1759_v13 = vmul.f32 %v3376_v24, %v3522_v8 }
  0xe3   : > { %v1401_v32 = vadd.f32 %v1307_v5, %v1156_v1  ;;  %v1623_v48 = vrot.slane %v1516_v41, 1  ;;  %v1760_v53 = vmul.f32 %v3376_v24, %v3527_v49  ;;  %v1761_v2 = vmul.f32 %v3376_v24, %v3535_v37 }
  0xe4   : > { %v1471_v44 = vadd.f32 %v1439_v43, %v1400_v31  ;;  %v1622_v7 = vsel %vm469_vm0, %v1620_v18, %v1621_v36  ;;  %v1865_v46 = vrot.slane %v1759_v13, 2  ;;  %v3593_v15 = vunpack.c.l.bf16 %v242_v20 }
  0xe5   : > { %v1472_v16 = vadd.f32 %v1440_v61, %v1401_v32  ;;  %v1624_v29 = vsel %vm469_vm0, %v1621_v36, %v1623_v48  ;;  %v1866_v55 = vrot.slane %v1760_v53, 2  ;;  %v1868_v45 = vrot.slane %v1761_v2, 2 }
  0xe6   : > { %v1717_v60 = vadd.f32 %v1622_v7, %v1471_v44  ;;  %v3596_v17 = vunpack.c.h.bf16 %v242_v20  ;;  %v314_v14 = vmul.f32 %v3280_v22, %v3272_v39  ;;  %v315_v25 = vmul.f32 %v3280_v22, %v3275_v12 }
  0xe7   : > { %v1718_v30 = vadd.f32 %v1624_v29, %v1472_v16  ;;  %v1867_v19 = vsel %vm715_vm1, %v1865_v46, %v1866_v55  ;;  %v1869_v43 = vsel %vm715_vm1, %v1866_v55, %v1868_v45  ;;  %v3604_v47 = vunpack.c.l.bf16 %v244_v10 }
  0xe8   : > { %v1962_v52 = vadd.f32 %v1867_v19, %v1717_v60  ;;  %v412_v38 = vmul.f32 %v3293_v26, %v3272_v39  ;;  %v413_v56 = vmul.f32 %v3293_v26, %v3275_v12  ;;  %v414_v57 = vmul.f32 %v3293_v26, %v3288_v23 }
  0xe9   : > { %v1963_v61 = vadd.f32 %v1869_v43, %v1718_v30  ;;  %v658_v62 = vmul.f32 %v3304_v28, %v3272_v39  ;;  %v659_v63 = vmul.f32 %v3304_v28, %v3275_v12  ;;  %v660_v1 = vmul.f32 %v3304_v28, %v3288_v23 }
  0xea   : > { %v535_v35 = vrot.slane %v412_v38, 1  ;;  %v536_v5 = vrot.slane %v413_v56, 1  ;;  %v538_v41 = vrot.slane %v414_v57, 1  ;;  %v893_v20 = vmul.f32 %v3315_v33, %v3454_v11 }
  0xeb   : > { %v1989_v31 = vpack.c.bf16 %v1963_v61, %v1962_v52  ;;  %v781_v18 = vrot.slane %v658_v62, 2  ;;  %v782_v36 = vrot.slane %v659_v63, 2  ;;  %v784_v13 = vrot.slane %v660_v1, 2 }
  0xec   : > { %v537_v32 = vsel %vm469_vm0, %v535_v35, %v536_v5  ;;  %v539_v39 = vsel %vm469_vm0, %v536_v5, %v538_v41  ;;  %v894_v12 = vmul.f32 %v3315_v33, %v3458_v50  ;;  %v976_v23 = vmul.f32 %v3326_v6, %v3454_v11 }
  0xed   : > { %2488 = vmatmul.mubr.msk.bf16.gmra.mxu0 %vm2023_vm2, %v1989_v31  ;;  %v608_v48 = vadd.f32 %v537_v32, %v314_v14  ;;  %v609_v53 = vadd.f32 %v539_v39, %v315_v25  ;;  %v783_v2 = vsel %vm715_vm1, %v781_v18, %v782_v36  ;;  %v785_v44 = vsel %vm715_vm1, %v782_v36, %v784_v13 }
  0xee   : > { %v977_v7 = vmul.f32 %v3326_v6, %v3458_v50  ;;  %v978_v46 = vmul.f32 %v3326_v6, %v3466_v27  ;;  %v1098_v10 = vrot.slane %v976_v23, 1  ;;  %v1221_v16 = vmul.f32 %v3340_v3, %v3454_v11 }
  0xef   : > { %v854_v29 = vadd.f32 %v783_v2, %v608_v48  ;;  %v855_v55 = vadd.f32 %v785_v44, %v609_v53  ;;  %v1222_v45 = vmul.f32 %v3340_v3, %v3458_v50  ;;  %v1223_v60 = vmul.f32 %v3340_v3, %v3466_v27 }
  0xf0   : > { %v1099_v14 = vrot.slane %v977_v7, 1  ;;  %v1101_v25 = vrot.slane %v978_v46, 1  ;;  %v1343_v30 = vrot.slane %v1221_v16, 2  ;;  %v1455_v19 = vmul.f32 %v3351_v0, %v3593_v15 }
  0xf1   : > { %v925_v43 = vadd.f32 %v893_v20, %v854_v29  ;;  %v926_v52 = vadd.f32 %v894_v12, %v855_v55  ;;  %v1344_v38 = vrot.slane %v1222_v45, 2  ;;  %v1346_v56 = vrot.slane %v1223_v60, 2 }
  0xf2   : > { %v1100_v57 = vsel %vm469_vm0, %v1098_v10, %v1099_v14  ;;  %v1102_v61 = vsel %vm469_vm0, %v1099_v14, %v1101_v25  ;;  %v1456_v62 = vmul.f32 %v3351_v0, %v3596_v17  ;;  %v1538_v63 = vmul.f32 %v3362_v40, %v3593_v15 }
  0xf3   : > { %v1171_v1 = vadd.f32 %v1100_v57, %v925_v43  ;;  %v1172_v35 = vadd.f32 %v1102_v61, %v926_v52  ;;  %v1345_v5 = vsel %vm715_vm1, %v1343_v30, %v1344_v38  ;;  %v1347_v41 = vsel %vm715_vm1, %v1344_v38, %v1346_v56 }
  0xf4   : > { %v1539_v20 = vmul.f32 %v3362_v40, %v3596_v17  ;;  %v1540_v31 = vmul.f32 %v3362_v40, %v3604_v47  ;;  %v1660_v18 = vrot.slane %v1538_v63, 1  ;;  %v1783_v36 = vmul.f32 %v3376_v24, %v3593_v15 }
  0xf5   : > { %v1416_v13 = vadd.f32 %v1345_v5, %v1171_v1  ;;  %v1417_v32 = vadd.f32 %v1347_v41, %v1172_v35  ;;  %v1784_v39 = vmul.f32 %v3376_v24, %v3596_v17  ;;  %v1785_v12 = vmul.f32 %v3376_v24, %v3604_v47 }
  0xf6   : > { %v1661_v23 = vrot.slane %v1539_v20, 1  ;;  %v1663_v48 = vrot.slane %v1540_v31, 1  ;;  %v1905_v53 = vrot.slane %v1783_v36, 2  ;;  %v300_v2 = vmul.f32 %v3280_v22, %v3384_v9 }
  0xf7   : > { %v1487_v44 = vadd.f32 %v1455_v19, %v1416_v13  ;;  %v1488_v7 = vadd.f32 %v1456_v62, %v1417_v32  ;;  %v1906_v46 = vrot.slane %v1784_v39, 2  ;;  %v1908_v10 = vrot.slane %v1785_v12, 2 }
  0xf8   : > { %v1662_v16 = vsel %vm469_vm0, %v1660_v18, %v1661_v23  ;;  %v1664_v29 = vsel %vm469_vm0, %v1661_v23, %v1663_v48  ;;  %v301_v55 = vmul.f32 %v3280_v22, %v3389_v4  ;;  %v391_v45 = vmul.f32 %v3293_v26, %v3384_v9 }
  0xf9   : > { %v1733_v60 = vadd.f32 %v1662_v16, %v1487_v44  ;;  %v1734_v14 = vadd.f32 %v1664_v29, %v1488_v7  ;;  %v1907_v25 = vsel %vm715_vm1, %v1905_v53, %v1906_v46  ;;  %v1909_v30 = vsel %vm715_vm1, %v1906_v46, %v1908_v10 }
  0xfa   : > { %v392_v19 = vmul.f32 %v3293_v26, %v3389_v4  ;;  %v393_v43 = vmul.f32 %v3293_v26, %v3397_v21  ;;  %v500_v52 = vrot.slane %v391_v45, 1  ;;  %v637_v38 = vmul.f32 %v3304_v28, %v3384_v9 }
  0xfb   : > { %v1978_v56 = vadd.f32 %v1907_v25, %v1733_v60  ;;  %v1979_v57 = vadd.f32 %v1909_v30, %v1734_v14  ;;  %v638_v61 = vmul.f32 %v3304_v28, %v3389_v4  ;;  %v639_v62 = vmul.f32 %v3304_v28, %v3397_v21 }
  0xfc   : > { %v501_v63 = vrot.slane %v392_v19, 1  ;;  %v503_v1 = vrot.slane %v393_v43, 1  ;;  %v746_v35 = vrot.slane %v637_v38, 2  ;;  %v879_v5 = vmul.f32 %v3315_v33, %v3522_v8 }
  0xfd   : > { %v1997_v41 = vpack.c.bf16 %v1979_v57, %v1978_v56  ;;  %v747_v20 = vrot.slane %v638_v61, 2  ;;  %v749_v31 = vrot.slane %v639_v62, 2  ;;  %v880_v9 = vmul.f32 %v3315_v33, %v3527_v49 }
  0xfe   : > { %v502_v18 = vsel %vm469_vm0, %v500_v52, %v501_v63  ;;  %v504_v36 = vsel %vm469_vm0, %v501_v63, %v503_v1  ;;  %v955_v4 = vmul.f32 %v3326_v6, %v3522_v8  ;;  %v956_v21 = vmul.f32 %v3326_v6, %v3527_v49  ;;  %v2456_v63 = vld [vmem:[%s2726_s9 + $0xc0] sm:$0xff]  }
  0xff   : > { %2504 = vmatmul.mubr.msk.bf16.gmra.mxu1 %vm2023_vm2, %v1997_v41  ;;  %v594_v13 = vadd.f32 %v502_v18, %v300_v2  ;;  %v595_v32 = vadd.f32 %v504_v36, %v301_v55  ;;  %v748_v39 = vsel %vm715_vm1, %v746_v35, %v747_v20  ;;  %v750_v12 = vsel %vm715_vm1, %v747_v20, %v749_v31 }
 0x100   : > { %v957_v23 = vmul.f32 %v3326_v6, %v3535_v37  ;;  %v1063_v48 = vrot.slane %v955_v4, 1  ;;  %v1064_v53 = vrot.slane %v956_v21, 1  ;;  %v1200_v44 = vmul.f32 %v3340_v3, %v3522_v8 }
 0x101   : > { %v840_v7 = vadd.f32 %v748_v39, %v594_v13  ;;  %v841_v46 = vadd.f32 %v750_v12, %v595_v32  ;;  %v1201_v10 = vmul.f32 %v3340_v3, %v3527_v49  ;;  %v1202_v2 = vmul.f32 %v3340_v3, %v3535_v37 }
 0x102   : > { %v1065_v16 = vsel %vm469_vm0, %v1063_v48, %v1064_v53  ;;  %v1066_v29 = vrot.slane %v957_v23, 1  ;;  %v1308_v55 = vrot.slane %v1200_v44, 2  ;;  %v1441_v45 = vmul.f32 %v3351_v0, %v2841_v34 }
 0x103   : > { %v911_v60 = vadd.f32 %v879_v5, %v840_v7  ;;  %v912_v14 = vadd.f32 %v880_v9, %v841_v46  ;;  %v1309_v25 = vrot.slane %v1201_v10, 2  ;;  %v1311_v30 = vrot.slane %v1202_v2, 2 }
 0x104   : > { %v1067_v19 = vsel %vm469_vm0, %v1064_v53, %v1066_v29  ;;  %v1442_v43 = vmul.f32 %v3351_v0, %v2846_v42  ;;  %v1517_v52 = vmul.f32 %v3362_v40, %v2841_v34  ;;  %v1518_v38 = vmul.f32 %v3362_v40, %v2846_v42 }
 0x105   : > { %v1157_v56 = vadd.f32 %v1065_v16, %v911_v60  ;;  %v1158_v57 = vadd.f32 %v1067_v19, %v912_v14  ;;  %v1310_v61 = vsel %vm715_vm1, %v1308_v55, %v1309_v25  ;;  %v1312_v62 = vsel %vm715_vm1, %v1309_v25, %v1311_v30  ;;  %v247_v25 = vld [vmem:[%s2726_s9 + $0xc8] sm:$0x1] }
 0x106   : > { %v1519_v1 = vmul.f32 %v3362_v40, %v2865_v58  ;;  %v1625_v35 = vrot.slane %v1517_v52, 1  ;;  %v1626_v5 = vrot.slane %v1518_v38, 1  ;;  %v1762_v41 = vmul.f32 %v3376_v24, %v2841_v34 }
 0x107   : > { %v1402_v20 = vadd.f32 %v1310_v61, %v1157_v56  ;;  %v1403_v31 = vadd.f32 %v1312_v62, %v1158_v57  ;;  %v1763_v9 = vmul.f32 %v3376_v24, %v2846_v42  ;;  %v1764_v18 = vmul.f32 %v3376_v24, %v2865_v58 }
 0x108   : > { %v1627_v36 = vsel %vm469_vm0, %v1625_v35, %v1626_v5  ;;  %v1628_v4 = vrot.slane %v1519_v1, 1  ;;  %v1870_v21 = vrot.slane %v1762_v41, 2  ;;  %v3722_v13 = vunpack.c.l.bf16 %v2456_v63 }
 0x109   : > { %v1473_v32 = vadd.f32 %v1441_v45, %v1402_v20  ;;  %v1474_v39 = vadd.f32 %v1442_v43, %v1403_v31  ;;  %v1871_v12 = vrot.slane %v1763_v9, 2  ;;  %v1873_v23 = vrot.slane %v1764_v18, 2 }
 0x10a   : > { %v1629_v48 = vsel %vm469_vm0, %v1626_v5, %v1628_v4  ;;  %v3725_v53 = vunpack.c.h.bf16 %v2456_v63  ;;  %v316_v44 = vmul.f32 %v3280_v22, %v3454_v11  ;;  %v317_v7 = vmul.f32 %v3280_v22, %v3458_v50 }
 0x10b   : > { %v1719_v46 = vadd.f32 %v1627_v36, %v1473_v32  ;;  %v1720_v10 = vadd.f32 %v1629_v48, %v1474_v39  ;;  %v1872_v2 = vsel %vm715_vm1, %v1870_v21, %v1871_v12  ;;  %v1874_v16 = vsel %vm715_vm1, %v1871_v12, %v1873_v23 }
 0x10c   : > { %v415_v29 = vmul.f32 %v3293_v26, %v3454_v11  ;;  %v416_v55 = vmul.f32 %v3293_v26, %v3458_v50  ;;  %v417_v45 = vmul.f32 %v3293_v26, %v3466_v27  ;;  %v661_v60 = vmul.f32 %v3304_v28, %v3454_v11 }
 0x10d   : > { %v1964_v14 = vadd.f32 %v1872_v2, %v1719_v46  ;;  %v1965_v22 = vadd.f32 %v1874_v16, %v1720_v10  ;;  %v662_v30 = vmul.f32 %v3304_v28, %v3458_v50  ;;  %v663_v19 = vmul.f32 %v3304_v28, %v3466_v27 }
 0x10e   : > { %v540_v43 = vrot.slane %v415_v29, 1  ;;  %v541_v52 = vrot.slane %v416_v55, 1  ;;  %v543_v38 = vrot.slane %v417_v45, 1  ;;  %v786_v56 = vrot.slane %v661_v60, 2 }
 0x10f   : > { %v1990_v57 = vpack.c.bf16 %v1965_v22, %v1964_v14  ;;  %v787_v61 = vrot.slane %v662_v30, 2  ;;  %v789_v62 = vrot.slane %v663_v19, 2  ;;  %v895_v26 = vmul.f32 %v3315_v33, %v3593_v15 }
 0x110   : > { %v542_v11 = vsel %vm469_vm0, %v540_v43, %v541_v52  ;;  %v544_v63 = vsel %vm469_vm0, %v541_v52, %v543_v38  ;;  %v896_v50 = vmul.f32 %v3315_v33, %v3596_v17  ;;  %v3752_v1 = vunpack.c.l.bf16 %v247_v25 }
 0x111   : > { %2491 = vmatprep.mubr.msk.bf16.mxu0 %vm2023_vm2, %v1990_v57  ;;  %v610_v28 = vadd.f32 %v542_v11, %v316_v44  ;;  %v611_v27 = vadd.f32 %v544_v63, %v317_v7  ;;  %v788_v35 = vsel %vm715_vm1, %v786_v56, %v787_v61  ;;  %v790_v5 = vsel %vm715_vm1, %v787_v61, %v789_v62  ;;  %v3794_v63 = vld [vmem:[%s4081_s1] ss:$0 sm:$0xff] }
 0x112   : > { %v979_v41 = vmul.f32 %v3326_v6, %v3593_v15  ;;  %v980_v20 = vmul.f32 %v3326_v6, %v3596_v17  ;;  %v981_v31 = vmul.f32 %v3326_v6, %v3604_v47  ;;  %v1224_v33 = vmul.f32 %v3340_v3, %v3593_v15 }
 0x113   : > { %v856_v9 = vadd.f32 %v788_v35, %v610_v28  ;;  %v857_v18 = vadd.f32 %v790_v5, %v611_v27  ;;  %v1225_v36 = vmul.f32 %v3340_v3, %v3596_v17  ;;  %v1226_v4 = vmul.f32 %v3340_v3, %v3604_v47 }
 0x114   : > { %v1103_v21 = vrot.slane %v979_v41, 1  ;;  %v1104_v32 = vrot.slane %v980_v20, 1  ;;  %v1106_v39 = vrot.slane %v981_v31, 1  ;;  %v1348_v12 = vrot.slane %v1224_v33, 2  ;;  %v3805_v41 = vld [vmem:[%s4081_s1 + $0x1] ss:$0 sm:$0xff] }
 0x115   : > { %v927_v23 = vadd.f32 %v895_v26, %v856_v9  ;;  %v928_v48 = vadd.f32 %v896_v50, %v857_v18  ;;  %v1349_v44 = vrot.slane %v1225_v36, 2  ;;  %v1351_v7 = vrot.slane %v1226_v4, 2  ;;  %v3816_v9 = vld [vmem:[%s4081_s1 + $0x2] ss:$0 sm:$0xff] }
 0x116   : > { %v1105_v6 = vsel %vm469_vm0, %v1103_v21, %v1104_v32  ;;  %v1107_v46 = vsel %vm469_vm0, %v1104_v32, %v1106_v39  ;;  %v1457_v10 = vmul.f32 %v3351_v0, %v3722_v13  ;;  %v1458_v2 = vmul.f32 %v3351_v0, %v3725_v53 }
 0x117   : > { %v1173_v16 = vadd.f32 %v1105_v6, %v927_v23  ;;  %v1174_v3 = vadd.f32 %v1107_v46, %v928_v48  ;;  %v1350_v29 = vsel %vm715_vm1, %v1348_v12, %v1349_v44  ;;  %v1352_v55 = vsel %vm715_vm1, %v1349_v44, %v1351_v7  ;;  %v3827_v46 = vld [vmem:[%s4081_s1 + $0x3] ss:$0 sm:$0xff] }
 0x118   : > { %v1541_v45 = vmul.f32 %v3362_v40, %v3722_v13  ;;  %v1542_v60 = vmul.f32 %v3362_v40, %v3725_v53  ;;  %v1543_v14 = vmul.f32 %v3362_v40, %v3752_v1  ;;  %v1786_v22 = vmul.f32 %v3376_v24, %v3722_v13 }
 0x119   : > { %v1418_v25 = vadd.f32 %v1350_v29, %v1173_v16  ;;  %v1419_v0 = vadd.f32 %v1352_v55, %v1174_v3  ;;  %v1787_v30 = vmul.f32 %v3376_v24, %v3725_v53  ;;  %v1788_v19 = vmul.f32 %v3376_v24, %v3752_v1 }
 0x11a   : > { %v1665_v43 = vrot.slane %v1541_v45, 1  ;;  %v1666_v52 = vrot.slane %v1542_v60, 1  ;;  %v1668_v38 = vrot.slane %v1543_v14, 1  ;;  %v1910_v56 = vrot.slane %v1786_v22, 2 }
 0x11b   : > { %v1489_v57 = vadd.f32 %v1457_v10, %v1418_v25  ;;  %v1490_v61 = vadd.f32 %v1458_v2, %v1419_v0  ;;  %v1911_v62 = vrot.slane %v1787_v30, 2  ;;  %v1913_v26 = vrot.slane %v1788_v19, 2  ;;  %v3838_v2 = vld [vmem:[%s4081_s1 + $0x4] ss:$0 sm:$0xff]  ;;  %v3852_v25 = vld [vmem:[%s4081_s1 + $0x5] ss:$0 sm:$0xff] }
 0x11c   : > { %v1667_v40 = vsel %vm469_vm0, %v1665_v43, %v1666_v52  ;;  %v1669_v11 = vsel %vm469_vm0, %v1666_v52, %v1668_v38  ;;  %v302_v24 = vmul.f32 %v3794_v63, %v3522_v8  ;;  %v303_v50 = vmul.f32 %v3794_v63, %v3527_v49 }
 0x11d   : > { %v1735_v28 = vadd.f32 %v1667_v40, %v1489_v57  ;;  %v1736_v27 = vadd.f32 %v1669_v11, %v1490_v61  ;;  %v1912_v35 = vsel %vm715_vm1, %v1910_v56, %v1911_v62  ;;  %v1914_v5 = vsel %vm715_vm1, %v1911_v62, %v1913_v26  ;;  %v3863_v61 = vld [vmem:[%s4081_s1 + $0x6] ss:$0 sm:$0xff] }
 0x11e   : > { %v394_v20 = vmul.f32 %v3805_v41, %v3522_v8  ;;  %v395_v31 = vmul.f32 %v3805_v41, %v3527_v49  ;;  %v396_v33 = vmul.f32 %v3805_v41, %v3535_v37  ;;  %v640_v18 = vmul.f32 %v3816_v9, %v3522_v8 }
 0x11f   : > { %v1980_v36 = vadd.f32 %v1912_v35, %v1735_v28  ;;  %v1981_v4 = vadd.f32 %v1914_v5, %v1736_v27  ;;  %v641_v21 = vmul.f32 %v3816_v9, %v3527_v49  ;;  %v642_v32 = vmul.f32 %v3816_v9, %v3535_v37 }
 0x120   : > { %v505_v39 = vrot.slane %v394_v20, 1  ;;  %v506_v12 = vrot.slane %v395_v31, 1  ;;  %v508_v23 = vrot.slane %v396_v33, 1  ;;  %v751_v48 = vrot.slane %v640_v18, 2 }
 0x121   : > { %v1998_v44 = vpack.c.bf16 %v1981_v4, %v1980_v36  ;;  %v752_v7 = vrot.slane %v641_v21, 2  ;;  %v754_v6 = vrot.slane %v642_v32, 2  ;;  %v881_v8 = vmul.f32 %v3827_v46, %v2841_v34  ;;  %v3887_v36 = vld [vmem:[%s4081_s1 + $0x8] ss:$0 sm:$0xff] }
 0x122   : > { %v507_v49 = vsel %vm469_vm0, %v505_v39, %v506_v12  ;;  %v509_v10 = vsel %vm469_vm0, %v506_v12, %v508_v23  ;;  %v882_v37 = vmul.f32 %v3827_v46, %v2846_v42  ;;  %v958_v16 = vmul.f32 %v3838_v2, %v2841_v34 }
 0x123   : > { %2507 = vmatprep.mubr.msk.bf16.mxu1 %vm2023_vm2, %v1998_v44  ;;  %v596_v3 = vadd.f32 %v507_v49, %v302_v24  ;;  %v597_v29 = vadd.f32 %v509_v10, %v303_v50  ;;  %v753_v55 = vsel %vm715_vm1, %v751_v48, %v752_v7  ;;  %v755_v45 = vsel %vm715_vm1, %v752_v7, %v754_v6  ;;  %v3874_v50 = vld [vmem:[%s4081_s1 + $0x7] ss:$0 sm:$0xff] }
 0x124   : > { %v959_v60 = vmul.f32 %v3838_v2, %v2846_v42  ;;  %v960_v14 = vmul.f32 %v3838_v2, %v2865_v58  ;;  %v1068_v22 = vrot.slane %v958_v16, 1  ;;  %v1203_v0 = vmul.f32 %v3852_v25, %v2841_v34 }
 0x125   : > { %v842_v30 = vadd.f32 %v753_v55, %v596_v3  ;;  %v843_v19 = vadd.f32 %v755_v45, %v597_v29  ;;  %v1204_v43 = vmul.f32 %v3852_v25, %v2846_v42  ;;  %v1205_v52 = vmul.f32 %v3852_v25, %v2865_v58 }
 0x126   : > { %v1069_v38 = vrot.slane %v959_v60, 1  ;;  %v1071_v56 = vrot.slane %v960_v14, 1  ;;  %v1313_v57 = vrot.slane %v1203_v0, 2  ;;  %v1443_v62 = vmul.f32 %v3863_v61, %v2857_v51 }
 0x127   : > { %v913_v34 = vadd.f32 %v881_v8, %v842_v30  ;;  %v914_v26 = vadd.f32 %v882_v37, %v843_v19  ;;  %v1314_v40 = vrot.slane %v1204_v43, 2  ;;  %v1316_v11 = vrot.slane %v1205_v52, 2 }
 0x128   : > { %v1070_v42 = vsel %vm469_vm0, %v1068_v22, %v1069_v38  ;;  %v1072_v24 = vsel %vm469_vm0, %v1069_v38, %v1071_v56  ;;  %v1444_v58 = vmul.f32 %v3863_v61, %v2859_v54  ;;  %v1520_v28 = vmul.f32 %v3874_v50, %v2857_v51 }
 0x129   : > { %v1159_v27 = vadd.f32 %v1070_v42, %v913_v34  ;;  %v1160_v35 = vadd.f32 %v1072_v24, %v914_v26  ;;  %v1315_v5 = vsel %vm715_vm1, %v1313_v57, %v1314_v40  ;;  %v1317_v20 = vsel %vm715_vm1, %v1314_v40, %v1316_v11  ;;  %v248_v26 = vld [vmem:[%s2726_s9 + $0xcc] sm:$0xff]   ;;  %v2481_v24 = vpop.f32.mrf.mxu0 }
 0x12a   : > { %v1521_v31 = vmul.f32 %v3874_v50, %v2859_v54  ;;  %v1522_v33 = vmul.f32 %v3874_v50, %v2867_v59  ;;  %v1630_v18 = vrot.slane %v1520_v28, 1  ;;  %v1765_v4 = vmul.f32 %v3887_v36, %v2857_v51 }
 0x12b   : > { %v1404_v21 = vadd.f32 %v1315_v5, %v1159_v27  ;;  %v1405_v32 = vadd.f32 %v1317_v20, %v1160_v35  ;;  %v1766_v39 = vmul.f32 %v3887_v36, %v2859_v54  ;;  %v1767_v12 = vmul.f32 %v3887_v36, %v2867_v59  ;;  %v2497_v5 = vpop.f32.mrf.mxu1  ;;  %v250_v20 = vld [vmem:[%s2726_s9 + $0xd4] sm:$0x1]  ;;  %s188_s9 = sand.u32 1, %s2629_s16  }
 0x12c   : > { %v1631_v23 = vrot.slane %v1521_v31, 1  ;;  %v1633_v48 = vrot.slane %v1522_v33, 1  ;;  %v1875_v44 = vrot.slane %v1765_v4, 2  ;;  %v318_v7 = vmul.f32 %v3794_v63, %v3593_v15  ;;  %s2377_s27 = sshll.u32 %s188_s9, 8  ;;  %s4040_s19 = scalar_lea.sflag [#allocation3], %s188_s9 }
 0x12d   : > { %v1475_v6 = vadd.f32 %v1443_v62, %v1404_v21  ;;  %v1476_v8 = vadd.f32 %v1444_v58, %v1405_v32  ;;  %v1876_v49 = vrot.slane %v1766_v39, 2  ;;  %v1878_v10 = vrot.slane %v1767_v12, 2  ;;  %s3967_s28 = scalar_lea.vmem [#allocation2], %s2377_s27 }
 0x12e   : > { %v1632_v51 = vsel %vm469_vm0, %v1630_v18, %v1631_v23  ;;  %v1634_v37 = vsel %vm469_vm0, %v1631_v23, %v1633_v48  ;;  %v319_v54 = vmul.f32 %v3794_v63, %v3596_v17  ;;  %v418_v59 = vmul.f32 %v3805_v41, %v3593_v15  ;;  %s2311_s30 = sshll.u32 %s3967_s28, 4  ;;  %s4034_s30 = int_to_ptr.vmem [resolvable:$true] %s2311_s30 }
 0x12f   : > { %v1721_v16 = vadd.f32 %v1632_v51, %v1475_v6  ;;  %v1722_v3 = vadd.f32 %v1634_v37, %v1476_v8  ;;  %v1877_v29 = vsel %vm715_vm1, %v1875_v44, %v1876_v49  ;;  %v1879_v55 = vsel %vm715_vm1, %v1876_v49, %v1878_v10  ;;  %v2106_v44 = vpop.f32.mrf.mxu0  ;;  %v2170_v49 = vpop.f32.mrf.mxu1  ;;  %s2577_s8 = scalar_lea.vmem %s4034_s30, 4096  ;;  %p2584_p0 = scmp.lt.s32.totalorder %s4034_s30, %s2582_s11 }
 0x130   : > { %v419_v45 = vmul.f32 %v3805_v41, %v3596_v17  ;;  %v420_v60 = vmul.f32 %v3805_v41, %v3604_v47  ;;  %v545_v14 = vrot.slane %v418_v59, 1  ;;  %v664_v22 = vmul.f32 %v3816_v9, %v3593_v15  ;;  %p2578_p11 = scmp.ne.s32.totalorder %s4034_s30, %s2577_s8  ;;  %p2585_p1 = scmp.lt.s32.totalorder %s2583_s12, %s2577_s8 }
 0x131   : > { %v1966_v63 = vadd.f32 %v1877_v29, %v1721_v16  ;;  %v1967_v0 = vadd.f32 %v1879_v55, %v1722_v3  ;;  %v665_v30 = vmul.f32 %v3816_v9, %v3596_v17  ;;  %v666_v19 = vmul.f32 %v3816_v9, %v3604_v47 }
 0x132   : > { %v546_v43 = vrot.slane %v419_v45, 1  ;;  %v548_v52 = vrot.slane %v420_v60, 1  ;;  %v791_v38 = vrot.slane %v664_v22, 2  ;;  %v897_v56 = vmul.f32 %v3827_v46, %v3722_v13  ;;  %v3953_v60 = vld [vmem:[%s4083_s3] ss:$0 sm:$0xff]  ;;  %p2579_p12 = pnand %p2578_p11, %p2705_p5  ;;  %p2586_p2 = por %p2585_p1, %p2584_p0 }
 0x133   : > { %v1991_v41 = vpack.c.bf16 %v1967_v0, %v1966_v63  ;;  %v792_v57 = vrot.slane %v665_v30, 2  ;;  %v794_v62 = vrot.slane %v666_v19, 2  ;;  %v898_v15 = vmul.f32 %v3827_v46, %v3725_v53 }
 0x134   : > { %v547_v34 = vsel %vm469_vm0, %v545_v14, %v546_v43  ;;  %v549_v17 = vsel %vm469_vm0, %v546_v43, %v548_v52  ;;  %v982_v47 = vmul.f32 %v3838_v2, %v3722_v13  ;;  %v983_v9 = vmul.f32 %v3838_v2, %v3725_v53  ;;  %v2482_v14 = vpop.f32.mrf.mxu0  ;;  %p2580_p13 = pneg %p2579_p12 }
 0x135   : > { %2492 = vmatmul.mubr.msk.bf16.gmra.mxu0 %vm2023_vm2, %v1991_v41  ;;  %v612_v40 = vadd.f32 %v547_v34, %v318_v7  ;;  %v613_v11 = vadd.f32 %v549_v17, %v319_v54  ;;  %v793_v42 = vsel %vm715_vm1, %v791_v38, %v792_v57  ;;  %v795_v46 = vsel %vm715_vm1, %v792_v57, %v794_v62 }
 0x136   : > { %v984_v58 = vmul.f32 %v3838_v2, %v3752_v1  ;;  %v1108_v28 = vrot.slane %v982_v47, 1  ;;  %v1109_v27 = vrot.slane %v983_v9, 1  ;;  %v1227_v35 = vmul.f32 %v3852_v25, %v3722_v13  ;;  %v2109_v17 = vpop.f32.mrf.mxu0  ;;  %p2587_p3 = pnand %p2586_p2, %p2580_p13 }
 0x137   : > { %v858_v31 = vadd.f32 %v793_v42, %v612_v40  ;;  %v859_v33 = vadd.f32 %v795_v46, %v613_v11  ;;  %v1228_v18 = vmul.f32 %v3852_v25, %v3725_v53  ;;  %v1229_v4 = vmul.f32 %v3852_v25, %v3752_v1 }
 0x138   : > { %v1110_v21 = vsel %vm469_vm0, %v1108_v28, %v1109_v27  ;;  %v1111_v32 = vrot.slane %v984_v58, 1  ;;  %v1353_v39 = vrot.slane %v1227_v35, 2  ;;  %v1423_v2 = vunpack.c.l.bf16 %v248_v26 }
 0x139   : > { %v929_v12 = vadd.f32 %v897_v56, %v858_v31  ;;  %v930_v23 = vadd.f32 %v898_v15, %v859_v33  ;;  %v1354_v48 = vrot.slane %v1228_v18, 2  ;;  %v1356_v13 = vrot.slane %v1229_v4, 2 }
 0x13a   : > { %v1112_v7 = vsel %vm469_vm0, %v1109_v27, %v1111_v32  ;;  %v1424_v6 = vunpack.c.h.bf16 %v248_v26  ;;  %v1459_v8 = vmul.f32 %v3863_v61, %v1423_v2  ;;  %v1494_v53 = vunpack.c.l.bf16 %v250_v20 }
 0x13b   : > { %v1175_v10 = vadd.f32 %v1110_v21, %v929_v12  ;;  %v1176_v1 = vadd.f32 %v1112_v7, %v930_v23  ;;  %v1355_v25 = vsel %vm715_vm1, %v1353_v39, %v1354_v48  ;;  %v1357_v51 = vsel %vm715_vm1, %v1354_v48, %v1356_v13 }
 0x13c   : > { %v1460_v37 = vmul.f32 %v3863_v61, %v1424_v6  ;;  %v1544_v54 = vmul.f32 %v3874_v50, %v1423_v2  ;;  %v1545_v59 = vmul.f32 %v3874_v50, %v1424_v6  ;;  %v1546_v16 = vmul.f32 %v3874_v50, %v1494_v53  ;;  %v2498_v50 = vpop.f32.mrf.mxu1 }
 0x13d   : > { %v1420_v3 = vadd.f32 %v1355_v25, %v1175_v10  ;;  %v1421_v29 = vadd.f32 %v1357_v51, %v1176_v1  ;;  %v1789_v55 = vmul.f32 %v3887_v36, %v1423_v2  ;;  %v1790_v45 = vmul.f32 %v3887_v36, %v1424_v6 }
 0x13e   : > { %v1670_v22 = vrot.slane %v1544_v54, 1  ;;  %v1671_v61 = vrot.slane %v1545_v59, 1  ;;  %v1673_v63 = vrot.slane %v1546_v16, 1  ;;  %v1791_v0 = vmul.f32 %v3887_v36, %v1494_v53  ;;  %v2173_v11 = vpop.f32.mrf.mxu1 }
 0x13f   : > { %v1491_v30 = vadd.f32 %v1459_v8, %v1420_v3  ;;  %v1492_v19 = vadd.f32 %v1460_v37, %v1421_v29  ;;  %v1915_v43 = vrot.slane %v1789_v55, 2  ;;  %v1916_v52 = vrot.slane %v1790_v45, 2 }
 0x140   : > { %v1672_v38 = vsel %vm469_vm0, %v1670_v22, %v1671_v61  ;;  %v1674_v56 = vsel %vm469_vm0, %v1671_v61, %v1673_v63  ;;  %v1918_v41 = vrot.slane %v1791_v0, 2  ;;  %v2115_v57 = vadd.f32 %v2481_v24, %v3953_v60 }
 0x141   : > { %v1737_v62 = vadd.f32 %v1672_v38, %v1491_v30  ;;  %v1738_v15 = vadd.f32 %v1674_v56, %v1492_v19  ;;  %v1917_v34 = vsel %vm715_vm1, %v1915_v43, %v1916_v52  ;;  %v2179_v36 = vadd.f32 %v2497_v5, %v3953_v60 }
 0x142   : > { %v1919_v47 = vsel %vm715_vm1, %v1916_v52, %v1918_v41  ;;  %v2235_v9 = vmax.f32 %v2115_v57, 0.0  ;;  %v2107_v26 = vadd.f32 %v3953_v60, %v2106_v44  ;;  %v2171_v40 = vadd.f32 %v3953_v60, %v2170_v49 }
 0x143   : > { %v1982_v42 = vadd.f32 %v1917_v34, %v1737_v62  ;;  %v1983_v46 = vadd.f32 %v1919_v47, %v1738_v15  ;;  %v2251_v58 = vmax.f32 %v2179_v36, 0.0  ;;  %v2118_v24 = vadd.f32 %v2482_v14, %v3953_v60 }
 0x144   : > { %2267 = vst [vmem:[%s3967_s28 + $0x10] sm:$0xff] %v2235_v9  ;;  %v2233_v28 = vmax.f32 %v2107_v26, 0.0  ;;  %v2249_v27 = vmax.f32 %v2171_v40, 0.0  ;;  %v2182_v35 = vadd.f32 %v2498_v50, %v3953_v60  ;;  %v2110_v5 = vadd.f32 %v3953_v60, %v2109_v17 }
 0x145   : > { %v1999_v20 = vpack.c.bf16 %v1983_v46, %v1982_v42  ;;  %2283 = vst [vmem:[%s3967_s28 + $0x90] sm:$0xff] %v2251_v58  ;;  %v2236_v31 = vmax.f32 %v2118_v24, 0.0  ;;  %v2174_v33 = vadd.f32 %v3953_v60, %v2173_v11 }
 0x146   : > { %2265 = vst [vmem:[%s3967_s28] sm:$0xff] %v2233_v28  ;;  %2281 = vst [vmem:[%s3967_s28 + $0x80] sm:$0xff] %v2249_v27  ;;  %v2252_v18 = vmax.f32 %v2182_v35, 0.0  ;;  %v2234_v4 = vmax.f32 %v2110_v5, 0.0 }
 0x147   : > { %2508 = vmatmul.mubr.msk.bf16.gmra.mxu1 %vm2023_vm2, %v1999_v20  ;;  %2268 = vst [vmem:[%s3967_s28 + $0x18] sm:$0xff] %v2236_v31  ;;  %v2250_v21 = vmax.f32 %v2174_v33, 0.0 }
 0x148   : > { %2284 = vst [vmem:[%s3967_s28 + $0x98] sm:$0xff] %v2252_v18  ;;  %2266 = vst [vmem:[%s3967_s28 + $0x8] sm:$0xff] %v2234_v4 }
 0x149   : > { %2282 = vst [vmem:[%s3967_s28 + $0x88] sm:$0xff] %v2250_v21 }
 0x163   : > { %v2485_v32 = vpop.f32.mrf.mxu0 }
 0x164   : > { %v2131_v39 = vadd.f32 %v2485_v32, %v3953_v60 }
 0x165   : > { %v2122_v2 = vpop.f32.mrf.mxu0 }
 0x166   : > { %v2239_v12 = vmax.f32 %v2131_v39, 0.0  ;;  %v2123_v23 = vadd.f32 %v3953_v60, %v2122_v2 }
 0x167   : > { %v2486_v48 = vpop.f32.mrf.mxu0 }
 0x168   : > { %2271 = vst [vmem:[%s3967_s28 + $0x30] sm:$0xff] %v2239_v12  ;;  %v2237_v13 = vmax.f32 %v2123_v23, 0.0  ;;  %v2134_v44 = vadd.f32 %v2486_v48, %v3953_v60 }
 0x169   : > { %v2125_v7 = vpop.f32.mrf.mxu0 }
 0x16a   : > { %2269 = vst [vmem:[%s3967_s28 + $0x20] sm:$0xff] %v2237_v13  ;;  %v2240_v6 = vmax.f32 %v2134_v44, 0.0  ;;  %v2126_v8 = vadd.f32 %v3953_v60, %v2125_v7 }
 0x16c   : > { %2272 = vst [vmem:[%s3967_s28 + $0x38] sm:$0xff] %v2240_v6  ;;  %v2238_v53 = vmax.f32 %v2126_v8, 0.0 }
 0x16e   : > { %2270 = vst [vmem:[%s3967_s28 + $0x28] sm:$0xff] %v2238_v53 }
 0x175   : > { %v2501_v49 = vpop.f32.mrf.mxu1 }
 0x176   : > { %v2195_v10 = vadd.f32 %v2501_v49, %v3953_v60 }
 0x177   : > { %v2186_v1 = vpop.f32.mrf.mxu1 }
 0x178   : > { %v2255_v25 = vmax.f32 %v2195_v10, 0.0  ;;  %v2187_v51 = vadd.f32 %v3953_v60, %v2186_v1 }
 0x179   : > { %v2502_v37 = vpop.f32.mrf.mxu1 }
 0x17a   : > { %2287 = vst [vmem:[%s3967_s28 + $0xb0] sm:$0xff] %v2255_v25  ;;  %v2253_v54 = vmax.f32 %v2187_v51, 0.0  ;;  %v2198_v59 = vadd.f32 %v2502_v37, %v3953_v60 }
 0x17b   : > { %v2189_v16 = vpop.f32.mrf.mxu1 }
 0x17c   : > { %2285 = vst [vmem:[%s3967_s28 + $0xa0] sm:$0xff] %v2253_v54  ;;  %v2256_v3 = vmax.f32 %v2198_v59, 0.0  ;;  %v2190_v29 = vadd.f32 %v3953_v60, %v2189_v16 }
 0x17e   : > { %2288 = vst [vmem:[%s3967_s28 + $0xb8] sm:$0xff] %v2256_v3  ;;  %v2254_v55 = vmax.f32 %v2190_v29, 0.0 }
 0x180   : > { %2286 = vst [vmem:[%s3967_s28 + $0xa8] sm:$0xff] %v2254_v55 }
 0x1ad   : > { %v2489_v45 = vpop.f32.mrf.mxu0 }
 0x1ae   : > { %v2147_v14 = vadd.f32 %v2489_v45, %v3953_v60 }
 0x1af   : > { %v2138_v22 = vpop.f32.mrf.mxu0 }
 0x1b0   : > { %v2243_v61 = vmax.f32 %v2147_v14, 0.0  ;;  %v2139_v63 = vadd.f32 %v3953_v60, %v2138_v22 }
 0x1b1   : > { %v2490_v0 = vpop.f32.mrf.mxu0 }
 0x1b2   : > { %2275 = vst [vmem:[%s3967_s28 + $0x50] sm:$0xff] %v2243_v61  ;;  %v2241_v50 = vmax.f32 %v2139_v63, 0.0  ;;  %v2150_v30 = vadd.f32 %v2490_v0, %v3953_v60 }
 0x1b3   : > { %v2141_v19 = vpop.f32.mrf.mxu0 }
 0x1b4   : > { %2273 = vst [vmem:[%s3967_s28 + $0x40] sm:$0xff] %v2241_v50  ;;  %v2244_v43 = vmax.f32 %v2150_v30, 0.0  ;;  %v2142_v52 = vadd.f32 %v3953_v60, %v2141_v19 }
 0x1b6   : > { %2276 = vst [vmem:[%s3967_s28 + $0x58] sm:$0xff] %v2244_v43  ;;  %v2242_v38 = vmax.f32 %v2142_v52, 0.0 }
 0x1b8   : > { %2274 = vst [vmem:[%s3967_s28 + $0x48] sm:$0xff] %v2242_v38 }
 0x1bf   : > { %v2505_v56 = vpop.f32.mrf.mxu1 }
 0x1c0   : > { %v2211_v41 = vadd.f32 %v2505_v56, %v3953_v60 }
 0x1c1   : > { %v2202_v57 = vpop.f32.mrf.mxu1 }
 0x1c2   : > { %v2259_v62 = vmax.f32 %v2211_v41, 0.0  ;;  %v2203_v15 = vadd.f32 %v3953_v60, %v2202_v57 }
 0x1c3   : > { %v2506_v34 = vpop.f32.mrf.mxu1 }
 0x1c4   : > { %2291 = vst [vmem:[%s3967_s28 + $0xd0] sm:$0xff] %v2259_v62  ;;  %v2257_v36 = vmax.f32 %v2203_v15, 0.0  ;;  %v2214_v17 = vadd.f32 %v2506_v34, %v3953_v60 }
 0x1c5   : > { %v2205_v47 = vpop.f32.mrf.mxu1 }
 0x1c6   : > { %2289 = vst [vmem:[%s3967_s28 + $0xc0] sm:$0xff] %v2257_v36  ;;  %v2260_v9 = vmax.f32 %v2214_v17, 0.0  ;;  %v2206_v26 = vadd.f32 %v3953_v60, %v2205_v47 }
 0x1c8   : > { %2292 = vst [vmem:[%s3967_s28 + $0xd8] sm:$0xff] %v2260_v9  ;;  %v2258_v40 = vmax.f32 %v2206_v26, 0.0 }
 0x1ca   : > { %2290 = vst [vmem:[%s3967_s28 + $0xc8] sm:$0xff] %v2258_v40 }
 0x1f5   : > { %v2493_v11 = vpop.f32.mrf.mxu0 }
 0x1f6   : > { %v2163_v42 = vadd.f32 %v2493_v11, %v3953_v60 }
 0x1f7   : > { %v2154_v46 = vpop.f32.mrf.mxu0 }
 0x1f8   : > { %v2247_v58 = vmax.f32 %v2163_v42, 0.0  ;;  %v2155_v24 = vadd.f32 %v3953_v60, %v2154_v46 }
 0x1f9   : > { %v2494_v28 = vpop.f32.mrf.mxu0 }
 0x1fa   : > { %2279 = vst [vmem:[%s3967_s28 + $0x70] sm:$0xff] %v2247_v58  ;;  %v2245_v27 = vmax.f32 %v2155_v24, 0.0  ;;  %v2166_v35 = vadd.f32 %v2494_v28, %v3953_v60 }
 0x1fb   : > { %v2157_v5 = vpop.f32.mrf.mxu0 }
 0x1fc   : > { %2277 = vst [vmem:[%s3967_s28 + $0x60] sm:$0xff] %v2245_v27  ;;  %v2248_v20 = vmax.f32 %v2166_v35, 0.0  ;;  %v2158_v31 = vadd.f32 %v3953_v60, %v2157_v5 }
 0x1fe   : > { %2280 = vst [vmem:[%s3967_s28 + $0x78] sm:$0xff] %v2248_v20  ;;  %v2246_v33 = vmax.f32 %v2158_v31, 0.0 }
 0x200   : > { %2278 = vst [vmem:[%s3967_s28 + $0x68] sm:$0xff] %v2246_v33 }
 0x207   : > { %v2509_v18 = vpop.f32.mrf.mxu1 }
 0x208   : > { %v2227_v4 = vadd.f32 %v2509_v18, %v3953_v60 }
 0x209   : > { %v2218_v21 = vpop.f32.mrf.mxu1 }
 0x20a   : > { %v2263_v32 = vmax.f32 %v2227_v4, 0.0  ;;  %v2219_v39 = vadd.f32 %v3953_v60, %v2218_v21 }
 0x20b   : > { %v2510_v2 = vpop.f32.mrf.mxu1 }
 0x20c   : > { %2295 = vst [vmem:[%s3967_s28 + $0xf0] sm:$0xff] %v2263_v32  ;;  %v2261_v12 = vmax.f32 %v2219_v39, 0.0  ;;  %v2230_v23 = vadd.f32 %v2510_v2, %v3953_v60 }
 0x20d   : > { %v2221_v48 = vpop.f32.mrf.mxu1 }
 0x20e   : > { %2293 = vst [vmem:[%s3967_s28 + $0xe0] sm:$0xff] %v2261_v12  ;;  %v2264_v13 = vmax.f32 %v2230_v23, 0.0  ;;  %v2222_v44 = vadd.f32 %v3953_v60, %v2221_v48 }
 0x210   : > { %2296 = vst [vmem:[%s3967_s28 + $0xf8] sm:$0xff] %v2264_v13  ;;  %v2262_v7 = vmax.f32 %v2222_v44, 0.0 }
 0x212   : > { %2294 = vst [vmem:[%s3967_s28 + $0xe8] sm:$0xff] %v2262_v7 }
 0x213   : > { %2590 = shalt.err (!%p2587_p3)
}
 0x214   : > { %s2591_s13 = scalar_lea.hbm %s4032_s7, 4096  ;;  %s2595_s9 = scalar_lea.hbm %s4084_s4, 8192 }
 0x215   : > { %p2592_p4 = scmp.ne.s32.totalorder %s4032_s7, %s2591_s13  ;;  %p2596_p9 = scmp.lt.s32.totalorder %s4032_s7, %s4084_s4 }
 0x216   : > { %p2597_p10 = scmp.lt.s32.totalorder %s2595_s9, %s2591_s13 }
 0x217   : > { %p2593_p7 = pnand %p2592_p4, %p2705_p5 }
 0x218   : > { %p2598_p11 = por %p2597_p10, %p2596_p9 }
 0x219   : > { %p2594_p8 = pneg %p2593_p7 }
 0x21b   : > { %p2599_p12 = pnand %p2598_p11, %p2594_p8 }
 0x21d   : > { %2602 = shalt.err (!%p2599_p12)
}
 0x21e   : > { %s2640_s27 = smov 128   ;;  %s2641_s28 = smov 8  }
 0x21f   : > { %2516 = dma.vmem_to_hbm [thread:$0]  (%p2705_p5), %s4034_s30, 4096, %s4032_s7, %s4040_s19, %s2640_s27, %s2640_s27, %s2641_s28  }
 0x220 PF: > { %p2522_p13 = scmp.ge.s32.totalorder %s2637_s18, 2  ;;  %s2326_s29 = sand.u32 1, %s2625_s15  }
 0x221   : > { %s2327_s5 = scalar_lea.sflag [#allocation3], %s2326_s29 }
 0x222   : > { %p2519_p0 = pnand %p2522_p13, %p2709_p6 }
 0x224   : > { %p2520_p1 = pneg %p2519_p0 }
 0x226   : > { %2620 = dma.done.wait (%p2520_p1), %s2327_s5, 4096  }
 0x227   : > { %2622 = vsyncadd (%p2520_p1), %s2327_s5, 4294963200  ;;  %p14_p2 = scmp.ge.s32.totalorder %s2692_s21, 4   ;;  %s4087_s15 = smov %s2629_s16 }
 0x228   : > { %s4088_s16 = smov %s2633_s17  ;;  %s4089_s17 = smov %s2703_s24 }
 0x229   : > { %s4090_s18 = smov %s2692_s21  ;;  %16 = sbr.rel (!%p14_p2) target bundleno = 3 (0x3), region = 71 }
 0x22e   :  { %2332 = vsyncpa [#allocation3], 1 }
 0x22f   :  { %2334 = vsyncpa [#allocation3 + $0x1], 1 }

</bundles_post_ra>
